<compile_context>
chip_gen: v7x
topology: tpu7x:2x2x1
jax: 0.10.0
libtpu: 0.0.40
codegen_flags: <defaults>
</compile_context>

<pallas_src>
import jax
import jax.numpy as jnp
import numpy as np
from jax import lax
from jax.experimental import pallas as pl
from jax.experimental.pallas import tpu as pltpu

SCALING_FACTOR = 1.0                 # `scaling_factor` arg of forward(); baked in
INV_SCALING = 1.0 / SCALING_FACTOR


def _round_up(n, m):
    return ((n + m - 1) // m) * m


def _potential_ctrl_kernel(t_ref, x_ref, mean_ref, var_ref,
                           w1x_ref, w1t_ref, b1_ref, w2_ref,
                           w2t_ref, w1xt_ref, b2_ref, out_ref):
    t = t_ref[...]          # (TB, 1)   f32
    x = x_ref[...]          # (TB, Dp)  f32
    mm_dtype = w1x_ref.dtype  # matmul operand dtype (f32 or bf16); accumulation is f32

    # OU SDE coefficients (per-sample scalars); EUP work minimized:
    #   s = exp(-t); sigma_sq = 1 - s^2; 1/c_i = exp(t) * rsqrt(var + sigma_sq)
    # NOTE: 1 - s*s cancels for t -> 0; if very small t matters use -expm1(-2t) instead.
    s = jnp.exp(-t)                                               # (TB, 1)
    sigma_sq = 1.0 - s * s                                        # (TB, 1)
    inv_c_i = (INV_SCALING * jnp.exp(t)) * lax.rsqrt(var_ref[...] + sigma_sq)  # (TB, Dp)
    c_m = (SCALING_FACTOR * s) * mean_ref[...]                    # (TB, Dp)
    x_scaled = (x - c_m) * inv_c_i                                # (TB, Dp)  f32

    # base_model(t, x_scaled): 2-layer tanh MLP on [x_scaled, t].
    # The t-column of W1 is rank-1 -> VPU broadcast multiply, folded with b1 (f32).
    z1 = jnp.dot(x_scaled.astype(mm_dtype), w1x_ref[...],
                 preferred_element_type=jnp.float32)              # (TB, Hp)  MXU
    z1 = z1 + t * w1t_ref[...] + b1_ref[...]                      # (TB, Hp)  VPU
    h = jnp.tanh(z1)                                              # (TB, Hp)  EUP (f32)
    f = jnp.dot(h.astype(mm_dtype), w2_ref[...],
                preferred_element_type=jnp.float32) + b2_ref[...]  # (TB, Dp) MXU

    # VJP of 0.5*||f||^2 w.r.t. x_scaled: ((f @ W2^T) * (1 - h^2)) @ W1x^T.
    # Pre-transposed resident weight copies -> plain dots, no in-kernel weight transpose.
    g = jnp.dot(f.astype(mm_dtype), w2t_ref[...],
                preferred_element_type=jnp.float32) * (1.0 - h * h)   # (TB, Hp)
    grad_model = jnp.dot(g.astype(mm_dtype), w1xt_ref[...],
                         preferred_element_type=jnp.float32)          # (TB, Dp)

    # dE/dx = (x_scaled + s * grad_model) / c_i ;  forward = -dE/dx
    out_ref[...] = -(x_scaled + s * grad_model) * inv_c_i


def potential_ctrl_forward(t, x, data_mean, data_scalar_var,
                           w1x, w1t, b1, w2, b2, *,
                           tile_b=512, matmul_dtype=jnp.float32):
    B, D = x.shape
    H = w1x.shape[1]
    f32 = jnp.float32

    # ---- lane-dense padding: D, H -> multiples of 128 (unmasked stores, full MXU cols)
    Dp = _round_up(D, 128)
    Hp = _round_up(H, 128)

    # ---- batch tiling: multiple of 8 sublanes, clamped to the (padded) batch.
    # Sweep tile_b in 256-1024 for production batches; keep grid length >= #TensorCores.
    tile_b = max(8, min(_round_up(tile_b, 8), _round_up(B, 8)))
    Bp = _round_up(B, tile_b)
    grid = (Bp // tile_b,)

    def pad2(a, rows, cols, val=0.0):
        a = a.astype(f32)
        return jnp.pad(a, ((0, rows - a.shape[0]), (0, cols - a.shape[1])),
                       constant_values=val)

    t_p = pad2(t.reshape(B, 1), Bp, 1, val=1.0)          # padded rows get a benign t
    x_p = pad2(x, Bp, Dp)
    mean_p = pad2(data_mean.reshape(1, D), 1, Dp)
    var_p = pad2(data_scalar_var.reshape(1, D), 1, Dp, val=1.0)  # keep rsqrt args > 0
    w1t_p = pad2(w1t.reshape(1, H), 1, Hp)
    b1_p = pad2(b1.reshape(1, H), 1, Hp)
    b2_p = pad2(b2.reshape(1, D), 1, Dp)
    # Matmul weights (optionally bf16 for the v6e/v7x MXU; halves resident VMEM & DMA).
    w1x_p = pad2(w1x, Dp, Hp).astype(matmul_dtype)       # (Dp, Hp)
    w2_p = pad2(w2, Hp, Dp).astype(matmul_dtype)         # (Hp, Dp)
    # Pre-transposed copies so the analytic-VJP dots never transpose weights in-kernel.
    w2t_p = jnp.transpose(w2_p)                          # (Dp, Hp)
    w1xt_p = jnp.transpose(w1x_p)                        # (Hp, Dp)

    batch_spec = lambda shape: pl.BlockSpec(shape, lambda i: (i, 0))   # tiled over batch
    resident = lambda shape: pl.BlockSpec(shape, lambda i: (0, 0))     # stays in VMEM

    # ---- explicit VMEM budget: 2x (double-buffered) tiles + resident weights + headroom
    weight_bytes = sum(int(a.size) * a.dtype.itemsize for a in
                       (mean_p, var_p, w1x_p, w1t_p, b1_p, w2_p, w2t_p, w1xt_p, b2_p))
    tile_bytes = 4 * tile_b * (1 + 2 * Dp)               # t + x + out tiles (f32)
    needed = 2 * (weight_bytes + tile_bytes)
    vmem_limit = int(min(128 * 2**20, max(32 * 2**20, needed + 8 * 2**20)))

    cost = pl.CostEstimate(
        flops=int(8 * Bp * Dp * Hp + 14 * Bp * Dp + 6 * Bp * Hp),
        transcendentals=int(Bp * (Hp + Dp + 2)),
        bytes_accessed=int(4 * Bp * (1 + 2 * Dp) + weight_bytes),
    )

    out_p = pl.pallas_call(
        _potential_ctrl_kernel,
        out_shape=jax.ShapeDtypeStruct((Bp, Dp), jnp.float32),
        grid=grid,
        in_specs=[
            batch_spec((tile_b, 1)),     # t
            batch_spec((tile_b, Dp)),    # x
            resident((1, Dp)),           # data_mean
            resident((1, Dp)),           # data_scalar_var
            resident((Dp, Hp)),          # W1 (x part)
            resident((1, Hp)),           # W1 (t part)
            resident((1, Hp)),           # b1
            resident((Hp, Dp)),          # W2
            resident((Dp, Hp)),          # W2^T   (pre-transposed, resident)
            resident((Hp, Dp)),          # W1x^T  (pre-transposed, resident)
            resident((1, Dp)),           # b2
        ],
        out_specs=batch_spec((tile_b, Dp)),
        compiler_params=pltpu.CompilerParams(
            dimension_semantics=("parallel",),   # batch axis shards across v7x's 2 TCs
            vmem_limit_bytes=vmem_limit),
        cost_estimate=cost,
    )(t_p, x_p, mean_p, var_p, w1x_p, w1t_p, b1_p, w2_p, w2t_p, w1xt_p, b2_p)

    return out_p[:B, :D]


# ---------------- plain-JAX reference (for self-check) ----------------
def _ref_forward(t, x, data_mean, data_scalar_var, w1x, w1t, b1, w2, b2):
    def energy_single(x_row, t_row):
        s = jnp.exp(-t_row)
        sigma_sq = 1.0 - jnp.exp(-2.0 * t_row)
        c_i = SCALING_FACTOR * s * jnp.sqrt(data_scalar_var + sigma_sq)
        c_m = SCALING_FACTOR * s * data_mean
        xs = (x_row - c_m) / c_i
        z1 = xs @ w1x + t_row @ w1t + b1[0]
        f = jnp.tanh(z1) @ w2 + b2[0]
        e = 0.5 * jnp.sum(jnp.square(xs)) + 0.5 * s[0] * jnp.sum(jnp.square(f))
        return e
    grad_fn = jax.vmap(jax.grad(lambda xr, tr: -energy_single(xr, tr)), in_axes=(0, 0))
    return grad_fn(x, t)


if __name__ == "__main__":
    # Small feature dims (as in the module's toy config); B=256 with tile_b=128 gives a
    # grid of length 2 so the parallel batch axis actually exercises megacore sharding.
    B, D, H = 256, 16, 32
    key = jax.random.PRNGKey(0)
    k_t, k_x, k_m, k_v, k_w1, k_w1t, k_b1, k_w2, k_b2 = jax.random.split(key, 9)

    # inputs
    t = jax.random.uniform(k_t, (B, 1), jnp.float32, minval=0.05, maxval=1.0)
    x = jax.random.normal(k_x, (B, D), jnp.float32)

    # buffers (data_mean, data_scalar_var) — deterministic synthetic values
    data_mean = 0.1 * jax.random.normal(k_m, (D,), jnp.float32)
    data_scalar_var = 0.5 + jax.random.uniform(k_v, (D,), jnp.float32)

    # base_model parameters: 2-layer tanh MLP, input = [x_scaled (D), t (1)]
    w1x = 0.2 * jax.random.normal(k_w1, (D, H), jnp.float32)
    w1t = 0.2 * jax.random.normal(k_w1t, (1, H), jnp.float32)
    b1 = 0.05 * jax.random.normal(k_b1, (1, H), jnp.float32)
    w2 = 0.2 * jax.random.normal(k_w2, (H, D), jnp.float32)
    b2 = 0.05 * jax.random.normal(k_b2, (1, D), jnp.float32)

    ref = _ref_forward(t, x, data_mean, data_scalar_var, w1x, w1t, b1, w2, b2)

    # f32 MXU path (default): tight check.
    out = potential_ctrl_forward(t, x, data_mean, data_scalar_var,
                                 w1x, w1t, b1, w2, b2, tile_b=128)
    out = jax.block_until_ready(out)
    np.testing.assert_allclose(np.asarray(out), np.asarray(ref), rtol=1e-4, atol=1e-4)

    # bf16 MXU path (production option on v6e/v7x): looser check.
    out_bf16 = jax.block_until_ready(
        potential_ctrl_forward(t, x, data_mean, data_scalar_var,
                               w1x, w1t, b1, w2, b2, tile_b=128,
                               matmul_dtype=jnp.bfloat16))
    np.testing.assert_allclose(np.asarray(out_bf16), np.asarray(ref), rtol=2e-1, atol=2e-1)

    print("KERNEL_OK")
</pallas_src>

<mosaic_0001>
module attributes {stable_mosaic.version = 11 : i64} {
  func.func @_potential_ctrl_kernel(%arg0: i32, %arg1: memref<128x1xf32, #tpu.memory_space<vmem>>, %arg2: memref<128x128xf32, #tpu.memory_space<vmem>>, %arg3: memref<1x128xf32, #tpu.memory_space<vmem>>, %arg4: memref<1x128xf32, #tpu.memory_space<vmem>>, %arg5: memref<128x128xf32, #tpu.memory_space<vmem>>, %arg6: memref<1x128xf32, #tpu.memory_space<vmem>>, %arg7: memref<1x128xf32, #tpu.memory_space<vmem>>, %arg8: memref<128x128xf32, #tpu.memory_space<vmem>>, %arg9: memref<128x128xf32, #tpu.memory_space<vmem>>, %arg10: memref<128x128xf32, #tpu.memory_space<vmem>>, %arg11: memref<1x128xf32, #tpu.memory_space<vmem>>, %arg12: memref<128x128xf32, #tpu.memory_space<vmem>>) attributes {dimension_semantics = [#tpu.dimension_semantics<parallel>], iteration_bounds = array<i64: 2>, scalar_prefetch = 0 : i64, scratch_operands = 0 : i64, tpu.core_type = #tpu.core_type<tc>, window_params = [{transform_indices = @transform_0, window_bounds = array<i64: 128, 1>}, {transform_indices = @transform_1, window_bounds = array<i64: 128, 128>}, {pipeline_mode = #tpu.pipeline_mode<synchronous>, transform_indices = @transform_2, window_bounds = array<i64: 1, 128>}, {pipeline_mode = #tpu.pipeline_mode<synchronous>, transform_indices = @transform_3, window_bounds = array<i64: 1, 128>}, {pipeline_mode = #tpu.pipeline_mode<synchronous>, transform_indices = @transform_4, window_bounds = array<i64: 128, 128>}, {pipeline_mode = #tpu.pipeline_mode<synchronous>, transform_indices = @transform_5, window_bounds = array<i64: 1, 128>}, {pipeline_mode = #tpu.pipeline_mode<synchronous>, transform_indices = @transform_6, window_bounds = array<i64: 1, 128>}, {pipeline_mode = #tpu.pipeline_mode<synchronous>, transform_indices = @transform_7, window_bounds = array<i64: 128, 128>}, {pipeline_mode = #tpu.pipeline_mode<synchronous>, transform_indices = @transform_8, window_bounds = array<i64: 128, 128>}, {pipeline_mode = #tpu.pipeline_mode<synchronous>, transform_indices = @transform_9, window_bounds = array<i64: 128, 128>}, {pipeline_mode = #tpu.pipeline_mode<synchronous>, transform_indices = @transform_10, window_bounds = array<i64: 1, 128>}, {transform_indices = @transform_11, window_bounds = array<i64: 128, 128>}]} {
    %c0 = arith.constant 0 : index
    %c0_0 = arith.constant 0 : index
    %0 = vector.load %arg1[%c0, %c0_0] : memref<128x1xf32, #tpu.memory_space<vmem>>, vector<128x1xf32>
    %c0_1 = arith.constant 0 : index
    %c0_2 = arith.constant 0 : index
    %1 = vector.load %arg2[%c0_1, %c0_2] : memref<128x128xf32, #tpu.memory_space<vmem>>, vector<128x128xf32>
    %cst = arith.constant 0.000000e+00 : f32
    %2 = vector.broadcast %cst : f32 to vector<128x1xf32>
    %3 = arith.subf %2, %0 : vector<128x1xf32>
    %4 = math.exp %3 : vector<128x1xf32>
    %5 = arith.mulf %4, %4 : vector<128x1xf32>
    %cst_3 = arith.constant 1.000000e+00 : f32
    %6 = vector.broadcast %cst_3 : f32 to vector<128x1xf32>
    %7 = arith.subf %6, %5 : vector<128x1xf32>
    %8 = math.exp %0 : vector<128x1xf32>
    %cst_4 = arith.constant 1.000000e+00 : f32
    %9 = vector.broadcast %cst_4 : f32 to vector<128x1xf32>
    %10 = arith.mulf %9, %8 : vector<128x1xf32>
    %c0_5 = arith.constant 0 : index
    %c0_6 = arith.constant 0 : index
    %11 = vector.load %arg4[%c0_5, %c0_6] : memref<1x128xf32, #tpu.memory_space<vmem>>, vector<1x128xf32>
    %12 = vector.broadcast %11 : vector<1x128xf32> to vector<128x128xf32>
    %13 = vector.broadcast %7 : vector<128x1xf32> to vector<128x128xf32>
    %14 = arith.addf %12, %13 : vector<128x128xf32>
    %15 = math.rsqrt %14 : vector<128x128xf32>
    %16 = vector.broadcast %10 : vector<128x1xf32> to vector<128x128xf32>
    %17 = arith.mulf %16, %15 : vector<128x128xf32>
    %cst_7 = arith.constant 1.000000e+00 : f32
    %18 = vector.broadcast %cst_7 : f32 to vector<128x1xf32>
    %19 = arith.mulf %18, %4 : vector<128x1xf32>
    %c0_8 = arith.constant 0 : index
    %c0_9 = arith.constant 0 : index
    %20 = vector.load %arg3[%c0_8, %c0_9] : memref<1x128xf32, #tpu.memory_space<vmem>>, vector<1x128xf32>
    %21 = vector.broadcast %19 : vector<128x1xf32> to vector<128x128xf32>
    %22 = vector.broadcast %20 : vector<1x128xf32> to vector<128x128xf32>
    %23 = arith.mulf %21, %22 : vector<128x128xf32>
    %24 = arith.subf %1, %23 : vector<128x128xf32>
    %25 = arith.mulf %24, %17 : vector<128x128xf32>
    %c0_10 = arith.constant 0 : index
    %c0_11 = arith.constant 0 : index
    %26 = vector.load %arg5[%c0_10, %c0_11] : memref<128x128xf32, #tpu.memory_space<vmem>>, vector<128x128xf32>
    %cst_12 = arith.constant dense<0.000000e+00> : vector<128x128xf32>
    %27 = tpu.matmul %25, %26, %cst_12 {dimension_numbers = #tpu.dot_dimension_numbers<[1], [0], [0], [1], [0, 0, 1, 1], [], []>} : vector<128x128xf32>, vector<128x128xf32>, vector<128x128xf32> -> vector<128x128xf32>
    %c0_13 = arith.constant 0 : index
    %c0_14 = arith.constant 0 : index
    %28 = vector.load %arg6[%c0_13, %c0_14] : memref<1x128xf32, #tpu.memory_space<vmem>>, vector<1x128xf32>
    %29 = vector.broadcast %0 : vector<128x1xf32> to vector<128x128xf32>
    %30 = vector.broadcast %28 : vector<1x128xf32> to vector<128x128xf32>
    %31 = arith.mulf %29, %30 : vector<128x128xf32>
    %32 = arith.addf %27, %31 : vector<128x128xf32>
    %c0_15 = arith.constant 0 : index
    %c0_16 = arith.constant 0 : index
    %33 = vector.load %arg7[%c0_15, %c0_16] : memref<1x128xf32, #tpu.memory_space<vmem>>, vector<1x128xf32>
    %34 = vector.broadcast %33 : vector<1x128xf32> to vector<128x128xf32>
    %35 = arith.addf %32, %34 : vector<128x128xf32>
    %36 = math.tanh %35 : vector<128x128xf32>
    %c0_17 = arith.constant 0 : index
    %c0_18 = arith.constant 0 : index
    %37 = vector.load %arg8[%c0_17, %c0_18] : memref<128x128xf32, #tpu.memory_space<vmem>>, vector<128x128xf32>
    %cst_19 = arith.constant dense<0.000000e+00> : vector<128x128xf32>
    %38 = tpu.matmul %36, %37, %cst_19 {dimension_numbers = #tpu.dot_dimension_numbers<[1], [0], [0], [1], [0, 0, 1, 1], [], []>} : vector<128x128xf32>, vector<128x128xf32>, vector<128x128xf32> -> vector<128x128xf32>
    %c0_20 = arith.constant 0 : index
    %c0_21 = arith.constant 0 : index
    %39 = vector.load %arg11[%c0_20, %c0_21] : memref<1x128xf32, #tpu.memory_space<vmem>>, vector<1x128xf32>
    %40 = vector.broadcast %39 : vector<1x128xf32> to vector<128x128xf32>
    %41 = arith.addf %38, %40 : vector<128x128xf32>
    %c0_22 = arith.constant 0 : index
    %c0_23 = arith.constant 0 : index
    %42 = vector.load %arg9[%c0_22, %c0_23] : memref<128x128xf32, #tpu.memory_space<vmem>>, vector<128x128xf32>
    %cst_24 = arith.constant dense<0.000000e+00> : vector<128x128xf32>
    %43 = tpu.matmul %41, %42, %cst_24 {dimension_numbers = #tpu.dot_dimension_numbers<[1], [0], [0], [1], [0, 0, 1, 1], [], []>} : vector<128x128xf32>, vector<128x128xf32>, vector<128x128xf32> -> vector<128x128xf32>
    %44 = arith.mulf %36, %36 : vector<128x128xf32>
    %cst_25 = arith.constant 1.000000e+00 : f32
    %45 = vector.broadcast %cst_25 : f32 to vector<128x128xf32>
    %46 = arith.subf %45, %44 : vector<128x128xf32>
    %47 = arith.mulf %43, %46 : vector<128x128xf32>
    %c0_26 = arith.constant 0 : index
    %c0_27 = arith.constant 0 : index
    %48 = vector.load %arg10[%c0_26, %c0_27] : memref<128x128xf32, #tpu.memory_space<vmem>>, vector<128x128xf32>
    %cst_28 = arith.constant dense<0.000000e+00> : vector<128x128xf32>
    %49 = tpu.matmul %47, %48, %cst_28 {dimension_numbers = #tpu.dot_dimension_numbers<[1], [0], [0], [1], [0, 0, 1, 1], [], []>} : vector<128x128xf32>, vector<128x128xf32>, vector<128x128xf32> -> vector<128x128xf32>
    %50 = vector.broadcast %4 : vector<128x1xf32> to vector<128x128xf32>
    %51 = arith.mulf %50, %49 : vector<128x128xf32>
    %52 = arith.addf %25, %51 : vector<128x128xf32>
    %cst_29 = arith.constant 0.000000e+00 : f32
    %53 = vector.broadcast %cst_29 : f32 to vector<128x128xf32>
    %54 = arith.subf %53, %52 : vector<128x128xf32>
    %55 = arith.mulf %54, %17 : vector<128x128xf32>
    %c0_30 = arith.constant 0 : index
    %c0_31 = arith.constant 0 : index
    %56 = vector.load %arg12[%c0_30, %c0_31] : memref<128x128xf32, #tpu.memory_space<vmem>>, vector<128x128xf32>
    tpu.vector_store %arg12[%c0_30, %c0_31], %55 {strides = array<i32>} : memref<128x128xf32, #tpu.memory_space<vmem>>, vector<128x128xf32>,
    return
  }
  func.func @transform_0(%arg0: i32) -> (i32, i32) {
    %c0_i32 = arith.constant 0 : i32
    %c0_i32_0 = arith.constant 0 : i32
    return %arg0, %c0_i32 : i32, i32
  }
  func.func @transform_1(%arg0: i32) -> (i32, i32) {
    %c0_i32 = arith.constant 0 : i32
    %c0_i32_0 = arith.constant 0 : i32
    return %arg0, %c0_i32 : i32, i32
  }
  func.func @transform_2(%arg0: i32) -> (i32, i32) {
    %c0_i32 = arith.constant 0 : i32
    %c0_i32_0 = arith.constant 0 : i32
    %c0_i32_1 = arith.constant 0 : i32
    return %c0_i32, %c0_i32_0 : i32, i32
  }
  func.func @transform_3(%arg0: i32) -> (i32, i32) {
    %c0_i32 = arith.constant 0 : i32
    %c0_i32_0 = arith.constant 0 : i32
    %c0_i32_1 = arith.constant 0 : i32
    return %c0_i32, %c0_i32_0 : i32, i32
  }
  func.func @transform_4(%arg0: i32) -> (i32, i32) {
    %c0_i32 = arith.constant 0 : i32
    %c0_i32_0 = arith.constant 0 : i32
    %c0_i32_1 = arith.constant 0 : i32
    return %c0_i32, %c0_i32_0 : i32, i32
  }
  func.func @transform_5(%arg0: i32) -> (i32, i32) {
    %c0_i32 = arith.constant 0 : i32
    %c0_i32_0 = arith.constant 0 : i32
    %c0_i32_1 = arith.constant 0 : i32
    return %c0_i32, %c0_i32_0 : i32, i32
  }
  func.func @transform_6(%arg0: i32) -> (i32, i32) {
    %c0_i32 = arith.constant 0 : i32
    %c0_i32_0 = arith.constant 0 : i32
    %c0_i32_1 = arith.constant 0 : i32
    return %c0_i32, %c0_i32_0 : i32, i32
  }
  func.func @transform_7(%arg0: i32) -> (i32, i32) {
    %c0_i32 = arith.constant 0 : i32
    %c0_i32_0 = arith.constant 0 : i32
    %c0_i32_1 = arith.constant 0 : i32
    return %c0_i32, %c0_i32_0 : i32, i32
  }
  func.func @transform_8(%arg0: i32) -> (i32, i32) {
    %c0_i32 = arith.constant 0 : i32
    %c0_i32_0 = arith.constant 0 : i32
    %c0_i32_1 = arith.constant 0 : i32
    return %c0_i32, %c0_i32_0 : i32, i32
  }
  func.func @transform_9(%arg0: i32) -> (i32, i32) {
    %c0_i32 = arith.constant 0 : i32
    %c0_i32_0 = arith.constant 0 : i32
    %c0_i32_1 = arith.constant 0 : i32
    return %c0_i32, %c0_i32_0 : i32, i32
  }
  func.func @transform_10(%arg0: i32) -> (i32, i32) {
    %c0_i32 = arith.constant 0 : i32
    %c0_i32_0 = arith.constant 0 : i32
    %c0_i32_1 = arith.constant 0 : i32
    return %c0_i32, %c0_i32_0 : i32, i32
  }
  func.func @transform_11(%arg0: i32) -> (i32, i32) {
    %c0_i32 = arith.constant 0 : i32
    %c0_i32_0 = arith.constant 0 : i32
    return %arg0, %c0_i32 : i32, i32
  }
}

</mosaic_0001>

<bundles_post_ra>
// kernel: tpu_custom_call.1
= control target key start
LH: loop header
LB: loop body
LE: loop exit
PB: predicated region body
PF: predicated region fallthrough
CT: control target
= control target key end

     0   :  { %s3792_s0 = inlined_call_operand.vmem [shape: f32[256,1], index: 0, kind: input, shape index: {}]   ;;  %s3793_s1 = inlined_call_operand.vmem [shape: f32[256,128], index: 1, kind: input, shape index: {}]   ;;  %s3794_s2 = inlined_call_operand.vmem [shape: f32[1,128], index: 2, kind: input, shape index: {}]   ;;  %s3795_s3 = inlined_call_operand.vmem [shape: f32[1,128], index: 3, kind: input, shape index: {}]   ;;  %s3796_s4 = inlined_call_operand.hbm [shape: f32[128,128], index: 4, kind: input, shape index: {}]   ;;  %s3797_s5 = inlined_call_operand.vmem [shape: f32[1,128], index: 5, kind: input, shape index: {}]   ;;  %s3798_s6 = inlined_call_operand.vmem [shape: f32[1,128], index: 6, kind: input, shape index: {}]   ;;  %s3799_s7 = inlined_call_operand.hbm [shape: f32[128,128], index: 7, kind: input, shape index: {}]   ;;  %s3800_s8 = inlined_call_operand.hbm [shape: f32[128,128], index: 8, kind: input, shape index: {}]   ;;  %s3801_s9 = inlined_call_operand.hbm [shape: f32[128,128], index: 9, kind: input, shape index: {}]   ;;  %s3802_s10 = inlined_call_operand.vmem [shape: f32[1,128], index: 10, kind: input, shape index: {}]   ;;  %s3803_s11 = inlined_call_operand.hbm [shape: f32[256,128], index: 11, kind: output, shape index: {}]  }
   0x1   :  { %3831 = sst [smem:[#allocation38_spill]] %s3803_s11 }
   0x2   :  { %16 = vsyncpa [#allocation3], 0 }
   0x3   :  { %17 = vsyncpa [#allocation6], 0 }
   0x4   :  { %18 = vsyncpa [#allocation9], 0 }
   0x5   :  { %19 = vsyncpa [#allocation4], 0 }
   0x6   :  { %21 = vsyncpa [#allocation4 + $0x1], 0  ;;  %s2994_s17 = smov 0   ;;  %s2996_s18 = smov 0  }
   0x7   :  { %s2998_s19 = smov 0   ;;  %s3000_s20 = smov 0  }
   0x8 LB: > { %3832 = sst [smem:[#allocation15_spill]] %s2910_s17  ;;  %s3015_s21 = sadd.s32 4294967295, %s2922_s20   ;;  %s2922_s20 = sphi %s3000_s20, %s3890_s20   ;;  %s2918_s19 = sphi %s2998_s19, %s3892_s19   ;;  %s2914_s18 = sphi %s2996_s18, %s3894_s18   ;;  %s2910_s17 = sphi %s2994_s17, %s3893_s17  }
   0x9   : > { %3833 = sst [smem:[#allocation16_spill]] %s2918_s19  ;;  %s2013_s22 = sadd.s32 4294967294, %s2922_s20  }
   0xa   : > { %3834 = sst [smem:[#allocation17_spill]] %s2922_s20  ;;  %s3019_s23 = sadd.s32 1, %s2922_s20  }
   0xb   : > { %3835 = sst [smem:[#allocation18_spill]] %s3019_s23  ;;  %s275_s24 = sadd.s32 1, %s2918_s19 }
   0xc   : > { %s272_s25 = ssub.s32 %s2922_s20, %s3019_s23  ;;  %p285_p0 = scmp.ne.s32.totalorder %s2918_s19, %s2914_s18 }
   0xd   : > { %p273_p1 = scmp.eq.s32.totalorder %s272_s25, 0  ;;  %p286_p2 = scmp.eq.s32.totalorder %s3015_s21, 1 }
   0xe   : > { %p291_p3 = scmp.ne.s32.totalorder %s2914_s18, %s2910_s17  ;;  %p292_p4 = scmp.eq.s32.totalorder %s2013_s22, 1 }
   0xf   : > { %s3030_s26 = scalar_select %p273_p1, %s2918_s19, %s275_s24  }
  0x10   : > { %p3032_p5 = por %p286_p2, %p285_p0  ;;  %p3036_p6 = por %p292_p4, %p291_p3 }
  0x11   : > { %3836 = sst [smem:[#allocation19_spill]] %s3030_s26  ;;  %p2014_p7 = scmp.ge.s32.totalorder %s2922_s20, 1 }
  0x12   : > { %s3837_s27 = scalar_select %p3032_p5, 1, 0 }
  0x13   : > { %s3838_s28 = scalar_select %p3036_p6, 1, 0 }
  0x14   : > { %p299_p8 = scmp.lt.s32.totalorder %s2922_s20, 3  ;;  %p3807_p9 = scmp.eq.s32.totalorder %s3015_s21, 0 }
  0x15   : > { %3839 = sst [smem:[#allocation20_spill]] %s3838_s28  ;;  %s2924_s30 = smov [#allocation5]  }
  0x16   : > { %p3043_p10 = pnand %p2014_p7, %p299_p8  ;;  %s336_s12 = sshll.u32 %s2924_s30, 4  ;;  %s3049_s12 = int_to_ptr.vmem [resolvable:$true] %s336_s12 }
  0x17   : > { %s2925_s14 = smov [#allocation2]   ;;  %s2926_s16 = smov [#allocation7]  }
  0x18   : > { %s3840_s29 = scalar_select %p3043_p10, 1, 0 }
  0x19   : > { %p2539_p11 = pneg %p3043_p10  ;;  %s317_s15 = sshll.u32 %s2925_s14, 4  ;;  %s3057_s15 = int_to_ptr.vmem [resolvable:$true] %s317_s15 }
  0x1a   : > { %s3059_s22 = sshll.u32 %s2926_s16, 4  ;;  %s2736_s26 = scalar_lea.hbm %s3799_s7, 2048  ;;  %s350_s22 = int_to_ptr.vmem [resolvable:$true] %s3059_s22 }
  0x1b   : > { %p3053_p12 = pnand %p3807_p9, %p2539_p11  ;;  %p2737_p13 = scmp.ne.s32.totalorder %s3799_s7, %s2736_s26 }
  0x1c   : > { %p2743_p3 = scmp.lt.u32.totalorder %s2736_s26, %s3799_s7 }
  0x1d   : > { %p3069_p0 = pneg %p3053_p12 }
  0x1f   : > { %p2739_p1 = pnand %p3069_p0, %p2737_p13 }
  0x21   : > { %p2740_p2 = pneg %p2739_p1 }
  0x23   : > { %p2745_p4 = pnand %p2743_p3, %p2740_p2 }
  0x25   : > { %2748 = shalt.err (!%p2745_p4)
}
  0x26   : > { %s2749_s19 = scalar_lea.vmem %s3049_s12, 2048  ;;  %p2757_p9 = scmp.lt.s32.totalorder %s3049_s12, %s3049_s12 }
  0x27   : > { %p2750_p7 = scmp.ne.s32.totalorder %s3049_s12, %s2749_s19  ;;  %p2758_p6 = scmp.lt.s32.totalorder %s2749_s19, %s2749_s19 }
  0x29   : > { %p2752_p8 = pnand %p2750_p7, %p3069_p0  ;;  %p2759_p13 = por %p2758_p6, %p2757_p9 }
  0x2b   : > { %p2753_p11 = pneg %p2752_p8 }
  0x2d   : > { %p2760_p1 = pnand %p2759_p13, %p2753_p11 }
  0x2f   : > { %2763 = shalt.err (!%p2760_p1)
}
  0x30   : > { %s2927_s24 = smov 128   ;;  %s2928_s26 = smov 8  }
  0x31   : > { %2545 = dma.hbm_to_vmem [thread:$0]  (!%p3053_p12), %s3799_s7, 2048, %s3049_s12, [#allocation6], %s2927_s24, %s2927_s24, %s2928_s26  }
  0x32   : > { %s2764_s19 = scalar_lea.hbm %s3796_s4, 2048 }
  0x33   : > { %p2765_p6 = scmp.ne.s32.totalorder %s3796_s4, %s2764_s19  ;;  %p2771_p3 = scmp.lt.u32.totalorder %s2764_s19, %s3796_s4 }
  0x35   : > { %p2767_p9 = pnand %p2765_p6, %p3069_p0 }
  0x37   : > { %p2768_p2 = pneg %p2767_p9 }
  0x39   : > { %p2773_p4 = pnand %p2771_p3, %p2768_p2 }
  0x3b   : > { %2776 = shalt.err (!%p2773_p4)
}
  0x3c   : > { %s2777_s12 = scalar_lea.vmem %s3057_s15, 2048  ;;  %p2785_p13 = scmp.lt.s32.totalorder %s3057_s15, %s3057_s15 }
  0x3d   : > { %p2778_p7 = scmp.ne.s32.totalorder %s3057_s15, %s2777_s12  ;;  %p2786_p1 = scmp.lt.s32.totalorder %s2777_s12, %s2777_s12 }
  0x3f   : > { %p2780_p8 = pnand %p2778_p7, %p3069_p0  ;;  %p2787_p6 = por %p2786_p1, %p2785_p13 }
  0x41   : > { %p2781_p11 = pneg %p2780_p8 }
  0x43   : > { %p2788_p9 = pnand %p2787_p6, %p2781_p11 }
  0x45   : > { %2791 = shalt.err (!%p2788_p9)
}
  0x46   : > { %2542 = dma.hbm_to_vmem [thread:$0]  (!%p3053_p12), %s3796_s4, 2048, %s3057_s15, [#allocation3], %s2927_s24, %s2927_s24, %s2928_s26  }
  0x47   : > { %s2792_s25 = scalar_lea.hbm %s3800_s8, 2048 }
  0x48   : > { %p2793_p2 = scmp.ne.s32.totalorder %s3800_s8, %s2792_s25  ;;  %p2799_p7 = scmp.lt.u32.totalorder %s2792_s25, %s3800_s8 }
  0x4a   : > { %p2795_p3 = pnand %p2793_p2, %p3069_p0 }
  0x4c   : > { %p2796_p4 = pneg %p2795_p3 }
  0x4e   : > { %p2801_p8 = pnand %p2799_p7, %p2796_p4 }
  0x50   : > { %2804 = shalt.err (!%p2801_p8)
}
  0x51   : > { %s2805_s12 = scalar_lea.vmem %s350_s22, 2048  ;;  %p2813_p6 = scmp.lt.s32.totalorder %s350_s22, %s350_s22 }
  0x52   : > { %p2806_p11 = scmp.ne.s32.totalorder %s350_s22, %s2805_s12  ;;  %p2814_p9 = scmp.lt.s32.totalorder %s2805_s12, %s2805_s12 }
  0x54   : > { %p2808_p13 = pnand %p2806_p11, %p3069_p0  ;;  %p2815_p5 = por %p2814_p9, %p2813_p6 }
  0x56   : > { %p2809_p1 = pneg %p2808_p13 }
  0x58   : > { %p2816_p10 = pnand %p2815_p5, %p2809_p1 }
  0x5a   : > { %2819 = shalt.err (!%p2816_p10)
}
  0x5b   : > { %2548 = dma.hbm_to_vmem [thread:$0]  (!%p3053_p12), %s3800_s8, 2048, %s350_s22, [#allocation6], %s2927_s24, %s2927_s24, %s2928_s26  }
  0x5c   : > { %s2929_s17 = smov [#allocation8]   ;;  %s2820_s30 = scalar_lea.hbm %s3801_s9, 2048 }
  0x5d   : > { %s362_s20 = sshll.u32 %s2929_s17, 4  ;;  %p2821_p5 = scmp.ne.s32.totalorder %s3801_s9, %s2820_s30  ;;  %s363_s20 = int_to_ptr.vmem [resolvable:$true] %s362_s20 }
  0x5e   : > { %p2827_p3 = scmp.lt.u32.totalorder %s2820_s30, %s3801_s9 }
  0x5f   : > { %p2823_p10 = pnand %p2821_p5, %p3069_p0 }
  0x61   : > { %p2824_p2 = pneg %p2823_p10 }
  0x63   : > { %p2829_p4 = pnand %p2827_p3, %p2824_p2 }
  0x65   : > { %2832 = shalt.err (!%p2829_p4)
}
  0x66   : > { %s2833_s22 = scalar_lea.vmem %s363_s20, 2048  ;;  %p2841_p13 = scmp.lt.s32.totalorder %s363_s20, %s363_s20 }
  0x67   : > { %p2834_p7 = scmp.ne.s32.totalorder %s363_s20, %s2833_s22  ;;  %p2842_p1 = scmp.lt.s32.totalorder %s2833_s22, %s2833_s22 }
  0x69   : > { %p2836_p8 = pnand %p2834_p7, %p3069_p0  ;;  %p2843_p6 = por %p2842_p1, %p2841_p13 }
  0x6b   : > { %p2837_p11 = pneg %p2836_p8 }
  0x6d   : > { %p2844_p9 = pnand %p2843_p6, %p2837_p11 }
  0x6f   : > { %2847 = shalt.err (!%p2844_p9)
}
  0x70   : > { %2551 = dma.hbm_to_vmem [thread:$0]  (!%p3053_p12), %s3801_s9, 2048, %s363_s20, [#allocation9], %s2927_s24, %s2927_s24, %s2928_s26  }
  0x71   : > { %p3843_p5 = scmp.ne.s32.totalorder %s3840_s29, 0 }
  0x73   : > { %399 = sbr.rel (%p3843_p5) target bundleno = 1275 (0x4fb), region = 64 }
  0x7a   : > { %p3844_p0 = scmp.eq.s32.totalorder %s3015_s21, 0 }
  0x7c   : > { %2893 = dma.done.wait (%p3844_p0), [#allocation3], 2048   ;;  %p3845_p10 = pmov %p3844_p0 }
  0x7d   : > { %p3846_p2 = pmov %p3844_p0 }
  0x7e   : > { %2895 = vsyncadd (%p3845_p10), [#allocation3], 4294965248 }
  0x7f   : > { %2897 = dma.done.wait (%p3846_p2), [#allocation6], 4096   ;;  %p3847_p3 = pmov %p3844_p0 }
  0x80   : > { %p3848_p4 = pmov %p3844_p0 }
  0x81   : > { %2899 = vsyncadd (%p3847_p3), [#allocation6], 4294963200 }
  0x82   : > { %2901 = dma.done.wait (%p3848_p4), [#allocation9], 2048   ;;  %p3849_p12 = pmov %p3844_p0 }
  0x83   : > { %s2026_s23 = sshll.u32 %s3015_s21, 4  ;;  %v2930_v0 = vmov 0   ;;  %v963_v38 = vld [vmem:[#allocation2] sm:$0xff]  ;;  %v964_v39 = vld [vmem:[#allocation2 + $0x8] sm:$0xff]  ;;  %v965_v50 = vld [vmem:[#allocation2 + $0x10] sm:$0xff]  ;;  %s3883_s25 = sld [smem:[#allocation38_spill]] }
  0x84   : > { %2903 = vsyncadd (%p3849_p12), [#allocation9], 4294965248  ;;  %2606 = vset.pattern.permute.xlu0 %v2930_v0  ;;  %p457_p7 = scmp.lt.s32.totalorder %s2026_s23, 31  ;;  %2607 = vset.pattern.permute.xlu1 %v2930_v0  ;;  %v2393_v41 = vpack.c.bf16 %v964_v39, %v963_v38  ;;  %v966_v51 = vld [vmem:[#allocation2 + $0x18] sm:$0xff]  ;;  %v967_v61 = vld [vmem:[#allocation2 + $0x20] sm:$0xff]  ;;  %p3885_p11 = scmp.ne.s32.totalorder %s3837_s27, 0 }
  0x85   : > { %v2397_v53 = vpack.c.bf16 %v966_v51, %v965_v50  ;;  %v968_v62 = vld [vmem:[#allocation2 + $0x28] sm:$0xff] }
  0x86   : > { %s3896_s23 = smov (!%p457_p7, %s2026_s23), 31  ;;  %2394 = vmatprep.subr.bf16.mxu0 %v2393_v41  ;;  %v2401_v0 = vpack.c.bf16 %v968_v62, %v967_v61 }
  0x87   : > { %s2027_s29 = sshll.u32 %s3896_s23, 3  ;;  %2396 = vmatpush3.bf16.msra.mxu0 %v2393_v41 }
  0x88   : > { %s3185_s26 = scalar_lea.vmem %s3792_s0, %s2027_s29  ;;  %2398 = vmatprep.subr.bf16.mxu0 %v2397_v53  ;;  %s3355_s16 = scalar_lea.vmem %s3793_s1, %s2027_s29 }
  0x89   : > { %v3188_v1 = vld [vmem:[%s3185_s26] sm:$0xff]  ;;  %v3191_v2 = vld [vmem:[%s3185_s26 + $0x8] sm:$0xff]  ;;  %v3194_v3 = vld [vmem:[%s3185_s26 + $0x10] sm:$0xff]  ;;  %s453_s29 = sand.u32 1, %s2914_s18  }
  0x8a   : > { %v581_v4 = vmul.f32 1.442695, %v3188_v1  ;;  %v501_v5 = vsub.f32 0.0, %v3188_v1  ;;  %v583_v6 = vmul.f32 1.442695, %v3191_v2  ;;  %v502_v7 = vsub.f32 0.0, %v3191_v2 }
  0x8b   : > { %v503_v8 = vsub.f32 0.0, %v3194_v3  ;;  %v3202_v9 = vld [vmem:[%s3185_s26 + $0x18] sm:$0xff]  ;;  %v3205_v10 = vld [vmem:[%s3185_s26 + $0x28] sm:$0xff]  ;;  %v3208_v11 = vld [vmem:[%s3185_s26 + $0x30] sm:$0xff]  ;;  %2400 = vmatpush3.bf16.msra.mxu0 %v2397_v53  ;;  %s2025_s13 = sshll.u32 %s453_s29, 7 }
  0x8c   : > { %2608 = vpow2.f32 %v581_v4  ;;  %v517_v12 = vmul.f32 1.442695, %v501_v5  ;;  %v504_v13 = vsub.f32 0.0, %v3202_v9  ;;  %v519_v14 = vmul.f32 1.442695, %v502_v7  ;;  %v3214_v19 = vld [vmem:[%s3185_s26 + $0x38] sm:$0xff]  ;;  %2402 = vmatprep.subr.bf16.mxu0 %v2401_v0 }
  0x8d   : > { %2610 = vpow2.f32 %v583_v6  ;;  %v521_v15 = vmul.f32 1.442695, %v503_v8  ;;  %v506_v16 = vsub.f32 0.0, %v3205_v10  ;;  %v507_v18 = vsub.f32 0.0, %v3208_v11  ;;  %v3217_v20 = vld [vmem:[%s3185_s26 + $0x20] sm:$0xff]  ;;  %v3226_v31 = vld [vmem:[%s3185_s26 + $0x48] sm:$0xff] }
  0x8e   : > { %2612 = vpow2.f32 %v517_v12  ;;  %v523_v17 = vmul.f32 1.442695, %v504_v13  ;;  %v508_v22 = vsub.f32 0.0, %v3214_v19  ;;  %v505_v24 = vsub.f32 0.0, %v3217_v20  ;;  %v3222_v25 = vld [vmem:[%s3185_s26 + $0x40] sm:$0xff]  ;;  %v3238_v49 = vld [vmem:[%s3185_s26 + $0x50] sm:$0xff] }
  0x8f   : > { %2614 = vpow2.f32 %v521_v15  ;;  %v527_v21 = vmul.f32 1.442695, %v506_v16  ;;  %v529_v23 = vmul.f32 1.442695, %v507_v18  ;;  %v509_v29 = vsub.f32 0.0, %v3222_v25  ;;  %v3248_v60 = vld [vmem:[%s3185_s26 + $0x58] sm:$0xff]  ;;  %2404 = vmatpush3.bf16.msra.mxu0 %v2401_v0 }
  0x90   : > { %2616 = vpow2.f32 %v519_v14  ;;  %v531_v26 = vmul.f32 1.442695, %v508_v22  ;;  %v525_v28 = vmul.f32 1.442695, %v505_v24  ;;  %v510_v35 = vsub.f32 0.0, %v3226_v31  ;;  %v969_v14 = vld [vmem:[#allocation2 + $0x30] sm:$0xff] }
  0x91   : > { %2618 = vpow2.f32 %v523_v17  ;;  %v533_v34 = vmul.f32 1.442695, %v509_v29  ;;  %v511_v54 = vsub.f32 0.0, %v3238_v49  ;;  %v585_v4 = vmul.f32 1.442695, %v3194_v3  ;;  %v970_v15 = vld [vmem:[#allocation2 + $0x38] sm:$0xff] }
  0x92   : > { %2620 = vpow2.f32 %v527_v21  ;;  %v535_v45 = vmul.f32 1.442695, %v510_v35  ;;  %v512_v6 = vsub.f32 0.0, %v3248_v60  ;;  %v2405_v17 = vpack.c.bf16 %v970_v15, %v969_v14  ;;  %v3272_v35 = vld [vmem:[%s3185_s26 + $0x68] sm:$0xff]  ;;  %s3684_s24 = scalar_lea.vmem [#allocation10], %s2025_s13 }
  0x93   : > { %2622 = vpow2.f32 %v529_v23  ;;  %v537_v5 = vmul.f32 1.442695, %v511_v54  ;;  %v587_v18 = vmul.f32 1.442695, %v3202_v9  ;;  %v589_v39 = vmul.f32 1.442695, %v3217_v20 }
  0x94   : > { %2624 = vpow2.f32 %v531_v26  ;;  %v539_v21 = vmul.f32 1.442695, %v512_v6  ;;  %2406 = vmatprep.subr.bf16.mxu0 %v2405_v17  ;;  %v3264_v26 = vld [vmem:[%s3185_s26 + $0x60] sm:$0xff]  ;;  %v591_v51 = vmul.f32 1.442695, %v3205_v10  ;;  %s1898_s17 = sshll.u32 %s3684_s24, 4  ;;  %s3744_s17 = int_to_ptr.vmem [resolvable:$true] %s1898_s17 }
  0x95   : > { %2626 = vpow2.f32 %v525_v28  ;;  %v972_v28 = vld [vmem:[#allocation2 + $0x48] sm:$0xff]  ;;  %2408 = vmatpush3.bf16.msra.mxu0 %v2405_v17  ;;  %v593_v6 = vmul.f32 1.442695, %v3208_v11  ;;  %s2848_s14 = scalar_lea.vmem %s3744_s17, 2048 }
  0x96   : > { %v2609_v27 = vpop.eup %2608  ;;  %2628 = vpow2.f32 %v533_v34  ;;  %p2849_p8 = scmp.ne.s32.totalorder %s3744_s17, %s2848_s14 }
  0x97   : > { %v2611_v30 = vpop.eup %2610  ;;  %734 = vperm.xlu0 %2606, %v2609_v27   ;;  %2630 = vpow2.f32 %v535_v45  ;;  %v971_v27 = vld [vmem:[#allocation2 + $0x40] sm:$0xff] }
  0x98   : > { %v2613_v32 = vpop.eup %2612  ;;  %739 = vperm.xlu1 %2607, %v2611_v30   ;;  %2632 = vpow2.f32 %v585_v4  ;;  %v2409_v30 = vpack.c.bf16 %v972_v28, %v971_v27  ;;  %p2850_p13 = pnand %p2849_p8, %p3885_p11 }
  0x99   : > { %v2615_v33 = vpop.eup %2614  ;;  %v549_v48 = vmul.f32 %v2613_v32, %v2613_v32  ;;  %2634 = vpow2.f32 %v537_v5  ;;  %v3292_v5 = vld [vmem:[%s3185_s26 + $0x78] sm:$0xff] }
  0x9a   : > { %v2617_v36 = vpop.eup %2616  ;;  %v551_v37 = vmul.f32 %v2615_v33, %v2615_v33  ;;  %2636 = vpow2.f32 %v587_v18  ;;  %2410 = vmatprep.subr.bf16.mxu0 %v2409_v30  ;;  %p2851_p1 = pneg %p2850_p13 }
  0x9b   : > { %831 = vperm.xlu0 %2606, %v2613_v32   ;;  %v3229_v40 = vpop.eup %2618  ;;  %v565_v57 = vsub.f32 1.0, %v549_v48  ;;  %v550_v59 = vmul.f32 %v2617_v36, %v2617_v36  ;;  %2638 = vpow2.f32 %v539_v21  ;;  %v513_v32 = vsub.f32 0.0, %v3264_v26  ;;  %2412 = vmatpush3.bf16.msra.mxu0 %v2409_v30 }
  0x9c   : > { %v567_v42 = vsub.f32 1.0, %v551_v37  ;;  %v552_v43 = vmul.f32 %v3229_v40, %v3229_v40  ;;  %v3233_v44 = vpop.eup %2620  ;;  %v974_v37 = vld [vmem:[#allocation2 + $0x58] sm:$0xff]  ;;  %2640 = vpow2.f32 %v589_v39  ;;  %v599_v30 = vmul.f32 1.442695, %v3226_v31 }
  0x9d   : > { %v554_v47 = vmul.f32 %v3233_v44, %v3233_v44  ;;  %v3240_v52 = vpop.eup %2622  ;;  %v566_v8 = vsub.f32 1.0, %v550_v59  ;;  %v541_v41 = vmul.f32 1.442695, %v513_v32 }
  0x9e   : > { %632 = vperm.xlu1 %2607, %v567_v42   ;;  %v568_v46 = vsub.f32 1.0, %v552_v43  ;;  %v3243_v55 = vpop.eup %2624  ;;  %v555_v58 = vmul.f32 %v3240_v52, %v3240_v52  ;;  %v514_v42 = vsub.f32 0.0, %v3272_v35 }
  0x9f   : > { %836 = vperm.xlu0 %2606, %v2617_v36   ;;  %v570_v56 = vsub.f32 1.0, %v554_v47  ;;  %v3250_v63 = vpop.eup %2626  ;;  %v556_v12 = vmul.f32 %v3243_v55, %v3243_v55  ;;  %v973_v36 = vld [vmem:[#allocation2 + $0x50] sm:$0xff]  ;;  %v976_v47 = vld [vmem:[#allocation2 + $0x68] sm:$0xff]  ;;  %2642 = vpow2.f32 %v541_v41  ;;  %v605_v41 = vmul.f32 1.442695, %v3264_v26 }
  0xa0   : > { %v571_v7 = vsub.f32 1.0, %v555_v58  ;;  %v553_v13 = vmul.f32 %v3250_v63, %v3250_v63  ;;  %v3258_v16 = vpop.eup %2628  ;;  %v2413_v38 = vpack.c.bf16 %v974_v37, %v973_v36  ;;  %v543_v53 = vmul.f32 1.442695, %v514_v42  ;;  %v978_v58 = vld [vmem:[#allocation2 + $0x78] sm:$0xff] }
  0xa1   : > { %v572_v22 = vsub.f32 1.0, %v556_v12  ;;  %v557_v24 = vmul.f32 %v3258_v16, %v3258_v16  ;;  %v3266_v29 = vpop.eup %2630  ;;  %2644 = vpow2.f32 %v591_v51 }
  0xa2   : > { %637 = vperm.xlu1 %2607, %v568_v46   ;;  %v569_v23 = vsub.f32 1.0, %v553_v13  ;;  %v558_v34 = vmul.f32 %v3266_v29, %v3266_v29  ;;  %2414 = vmatprep.subr.bf16.mxu0 %v2413_v38  ;;  %v2633_v43 = vpop.eup %2632  ;;  %v975_v46 = vld [vmem:[#allocation2 + $0x60] sm:$0xff]  ;;  %2646 = vpow2.f32 %v543_v53 }
  0xa3   : > { %841 = vperm.xlu0 %2606, %v2615_v33   ;;  %v573_v33 = vsub.f32 1.0, %v557_v24  ;;  %v3277_v48 = vpop.eup %2634  ;;  %2416 = vmatpush3.bf16.msra.mxu0 %v2413_v38  ;;  %v2417_v50 = vpack.c.bf16 %v976_v47, %v975_v46  ;;  %2648 = vpow2.f32 %v593_v6  ;;  %v611_v46 = vmul.f32 1.442695, %v3292_v5 }
  0xa4   : > { %v574_v45 = vsub.f32 1.0, %v558_v34  ;;  %v2637_v54 = vpop.eup %2636 }
  0xa5   : > { %2418 = vmatprep.subr.bf16.mxu0 %v2417_v50  ;;  %v3285_v59 = vpop.eup %2638 }
  0xa6   : > { %647 = vperm.xlu1 %2607, %v570_v56   ;;  %v3283_v56 = vld [vmem:[%s3185_s26 + $0x70] sm:$0xff]  ;;  %v560_v4 = vmul.f32 %v3285_v59, %v3285_v59  ;;  %v2641_v12 = vpop.eup %2640  ;;  %s2040_s26 = sshll.u32 %s3015_s21, 11  ;;  %s3751_s21 = scalar_lea.sflag [#allocation4], %s453_s29 }
  0xa7   : > { %622 = vperm.xlu0 %2606, %v565_v57   ;;  %v977_v57 = vld [vmem:[#allocation2 + $0x70] sm:$0xff]  ;;  %2420 = vmatpush3.bf16.msra.mxu0 %v2417_v50  ;;  %v515_v62 = vsub.f32 0.0, %v3283_v56  ;;  %s3742_s30 = scalar_lea.hbm %s3883_s25, %s2040_s26 }
  0xa8   : > { %v2421_v61 = vpack.c.bf16 %v978_v58, %v977_v57  ;;  %v576_v13 = vsub.f32 1.0, %v560_v4  ;;  %v3339_v58 = vld [vmem:[%s3795_s3] ss:$0 sm:$0xff] }
  0xa9   : > { %v2643_v14 = vpop.eup %2642 }
  0xaa   : > { %652 = vperm.xlu1 %2607, %v571_v7   ;;  %2422 = vmatprep.subr.bf16.mxu0 %v2421_v61  ;;  %v545_v7 = vmul.f32 1.442695, %v515_v62  ;;  %v561_v18 = vmul.f32 %v2643_v14, %v2643_v14 }
  0xab   : > { %627 = vperm.xlu0 %2606, %v566_v8   ;;  %2424 = vmatpush3.bf16.msra.mxu0 %v2421_v61  ;;  %v516_v8 = vsub.f32 0.0, %v3292_v5  ;;  %v2645_v17 = vpop.eup %2644 }
  0xac   : > { %2650 = vpow2.f32 %v545_v7  ;;  %v2647_v21 = vpop.eup %2646 }
  0xad   : > { %v547_v15 = vmul.f32 1.442695, %v516_v8  ;;  %v2649_v24 = vpop.eup %2648  ;;  %v3348_v8 = vld [vmem:[%s3794_s2] ss:$0 sm:$0xff] }
  0xae   : > { %657 = vperm.xlu1 %2607, %v572_v22   ;;  %v577_v22 = vsub.f32 1.0, %v561_v18 }
  0xaf   : > { %642 = vperm.xlu0 %2606, %v569_v23   ;;  %v562_v23 = vmul.f32 %v2647_v21, %v2647_v21 }
  0xb1   : > { %v578_v27 = vsub.f32 1.0, %v562_v23 }
  0xb2   : > { %662 = vperm.xlu1 %2607, %v573_v33  }
  0xb3   : > { %846 = vperm.xlu0 %2606, %v3229_v40   ;;  %v559_v40 = vmul.f32 %v3277_v48, %v3277_v48 }
  0xb5   : > { %v575_v0 = vsub.f32 1.0, %v559_v40 }
  0xb6   : > { %667 = vperm.xlu1 %2607, %v574_v45   ;;  %v2651_v28 = vpop.eup %2650  ;;  %v609_v45 = vmul.f32 1.442695, %v3283_v56 }
  0xb7   : > { %744 = vperm.xlu0 %2606, %v2633_v43   ;;  %v563_v33 = vmul.f32 %v2651_v28, %v2651_v28  ;;  %v607_v43 = vmul.f32 1.442695, %v3272_v35 }
  0xb9   : > { %v579_v36 = vsub.f32 1.0, %v563_v33  ;;  %v487_v33 = vld [vmem:[%s3355_s16 + $0x10] sm:$0xff] }
  0xba   : > { %749 = vperm.xlu1 %2607, %v2637_v54  }
  0xbb   : > { %851 = vperm.xlu0 %2606, %v3250_v63   ;;  %v595_v63 = vmul.f32 1.442695, %v3214_v19 }
  0xbd   : > { %2652 = vpow2.f32 %v595_v63 }
  0xbe   : > { %672 = vperm.xlu1 %2607, %v575_v0   ;;  %2654 = vpow2.f32 %v547_v15 }
  0xbf   : > { %856 = vperm.xlu0 %2606, %v3233_v44   ;;  %v597_v44 = vmul.f32 1.442695, %v3222_v25 }
  0xc1   : > { %2656 = vpow2.f32 %v597_v44 }
  0xc2   : > { %677 = vperm.xlu1 %2607, %v576_v13   ;;  %2658 = vpow2.f32 %v599_v30 }
  0xc3   : > { %754 = vperm.xlu0 %2606, %v2641_v12  }
  0xc6   : > { %759 = vperm.xlu1 %2607, %v2645_v17   ;;  %v485_v17 = vld [vmem:[%s3355_s16] sm:$0xff] }
  0xc7   : > { %861 = vperm.xlu0 %2606, %v3240_v52   ;;  %v2653_v32 = vpop.eup %2652  ;;  %v601_v52 = vmul.f32 1.442695, %v3238_v49 }
  0xc8   : > { %v2655_v34 = vpop.eup %2654 }
  0xc9   : > { %v564_v37 = vmul.f32 %v2655_v34, %v2655_v34  ;;  %2660 = vpow2.f32 %v601_v52 }
  0xca   : > { %682 = vperm.xlu1 %2607, %v577_v22  }
  0xcb   : > { %866 = vperm.xlu0 %2606, %v3243_v55   ;;  %v603_v55 = vmul.f32 1.442695, %v3248_v60  ;;  %v580_v38 = vsub.f32 1.0, %v564_v37  ;;  %v2657_v39 = vpop.eup %2656 }
  0xcc   : > { %v2659_v42 = vpop.eup %2658 }
  0xcd   : > { %2662 = vpow2.f32 %v603_v55 }
  0xce   : > { %687 = vperm.xlu1 %2607, %v578_v27   ;;  %2664 = vpow2.f32 %v605_v41 }
  0xcf   : > { %764 = vperm.xlu0 %2606, %v2649_v24   ;;  %2666 = vpow2.f32 %v607_v43  ;;  %v486_v24 = vld [vmem:[%s3355_s16 + $0x8] sm:$0xff]  ;;  %v488_v43 = vld [vmem:[%s3355_s16 + $0x18] sm:$0xff] }
  0xd0   : > { %2668 = vpow2.f32 %v609_v45 }
  0xd1   : > { %2670 = vpow2.f32 %v611_v46 }
  0xd2   : > { %769 = vperm.xlu1 %2607, %v2653_v32  }
  0xd3   : > { %871 = vperm.xlu0 %2606, %v3258_v16   ;;  %v2661_v16 = vpop.eup %2660 }
  0xd6   : > { %692 = vperm.xlu1 %2607, %v579_v36  }
  0xd7   : > { %876 = vperm.xlu0 %2606, %v3266_v29   ;;  %v2663_v29 = vpop.eup %2662 }
  0xd8   : > { %v2665_v47 = vpop.eup %2664 }
  0xd9   : > { %v2667_v50 = vpop.eup %2666 }
  0xda   : > { %697 = vperm.xlu1 %2607, %v580_v38  }
  0xdb   : > { %774 = vperm.xlu0 %2606, %v2657_v39  }
  0xde   : > { %779 = vperm.xlu1 %2607, %v2659_v42  }
  0xdf   : > { %881 = vperm.xlu0 %2606, %v3277_v48   ;;  %v2669_v48 = vpop.eup %2668 }
  0xe0   : > { %v2671_v51 = vpop.eup %2670 }
  0xe2   : > { %886 = vperm.xlu1 %2607, %v3285_v59  }
  0xe3   : > { %784 = vperm.xlu0 %2606, %v2661_v16  }
  0xe6   : > { %789 = vperm.xlu1 %2607, %v2663_v29  }
  0xe7   : > { %891 = vperm.xlu0 %2606, %v2643_v14  }
  0xea   : > { %896 = vperm.xlu1 %2607, %v2647_v21  }
  0xeb   : > { %794 = vperm.xlu0 %2606, %v2665_v47  }
  0xee   : > { %799 = vperm.xlu1 %2607, %v2667_v50  }
  0xef   : > { %901 = vperm.xlu0 %2606, %v2651_v28  }
  0xf2   : > { %906 = vperm.xlu1 %2607, %v2655_v34  }
  0xf3   : > { %804 = vperm.xlu0 %2606, %v2669_v48  }
  0xf6   : > { %809 = vperm.xlu1 %2607, %v2671_v51  }
  0xf7   : > { %982 = vperm.xlu0 %2606, %v3188_v1  }
  0xfa   : > { %987 = vperm.xlu1 %2607, %v3191_v2   ;;  %v1266_v2 = vld [vmem:[#allocation5] sm:$0xff] }
  0xfb   : > { %992 = vperm.xlu0 %2606, %v3194_v3   ;;  %v1267_v3 = vld [vmem:[#allocation5 + $0x8] sm:$0xff] }
  0xfe   : > { %997 = vperm.xlu1 %2607, %v3202_v9   ;;  %v1268_v9 = vld [vmem:[#allocation5 + $0x10] sm:$0xff] }
  0xff   : > { %1002 = vperm.xlu0 %2606, %v3217_v20  }
 0x102   : > { %1007 = vperm.xlu1 %2607, %v3205_v10  }
 0x103   : > { %1012 = vperm.xlu0 %2606, %v3208_v11   ;;  %v2425_v11 = vpack.c.bf16 %v1267_v3, %v1266_v2 }
 0x105   : > { %2426 = vmatprep.subr.bf16.mxu1 %v2425_v11 }
 0x106   : > { %1017 = vperm.xlu1 %2607, %v3214_v19   ;;  %v1269_v19 = vld [vmem:[#allocation5 + $0x18] sm:$0xff]  ;;  %2428 = vmatpush3.bf16.msra.mxu1 %v2425_v11 }
 0x107   : > { %1022 = vperm.xlu0 %2606, %v3222_v25   ;;  %v2429_v20 = vpack.c.bf16 %v1269_v19, %v1268_v9  ;;  %v1270_v25 = vld [vmem:[#allocation5 + $0x20] sm:$0xff] }
 0x108   : > { %v489_v9 = vld [vmem:[%s3355_s16 + $0x20] sm:$0xff] }
 0x109   : > { %2430 = vmatprep.subr.bf16.mxu1 %v2429_v20 }
 0x10a   : > { %1027 = vperm.xlu1 %2607, %v3226_v31   ;;  %v1271_v31 = vld [vmem:[#allocation5 + $0x28] sm:$0xff]  ;;  %2432 = vmatpush3.bf16.msra.mxu1 %v2429_v20 }
 0x10b   : > { %1032 = vperm.xlu0 %2606, %v3238_v49  }
 0x10e   : > { %1037 = vperm.xlu1 %2607, %v3248_v60   ;;  %v2433_v60 = vpack.c.bf16 %v1271_v31, %v1270_v25 }
 0x10f   : > { %1042 = vperm.xlu0 %2606, %v3264_v26   ;;  %v1272_v26 = vld [vmem:[#allocation5 + $0x30] sm:$0xff] }
 0x110   : > { %2434 = vmatprep.subr.bf16.mxu1 %v2433_v60 }
 0x111   : > { %2436 = vmatpush3.bf16.msra.mxu1 %v2433_v60 }
 0x112   : > { %1047 = vperm.xlu1 %2607, %v3272_v35   ;;  %v1273_v35 = vld [vmem:[#allocation5 + $0x38] sm:$0xff] }
 0x113   : > { %1052 = vperm.xlu0 %2606, %v3283_v56   ;;  %v2437_v40 = vpack.c.bf16 %v1273_v35, %v1272_v26  ;;  %v490_v26 = vld [vmem:[%s3355_s16 + $0x28] sm:$0xff] }
 0x115   : > { %2438 = vmatprep.subr.bf16.mxu1 %v2437_v40 }
 0x116   : > { %v735_v1 = vpop.permute.xlu0 %734  ;;  %1057 = vperm.xlu1 %2607, %v3292_v5   ;;  %2440 = vmatpush3.bf16.msra.mxu1 %v2437_v40 }
 0x117   : > { %v3328_v10 = vpop.permute.xlu1 %739 }
 0x11a   : > { %v3330_v49 = vpop.permute.xlu0 %831 }
 0x11b   : > { %v915_v14 = vmul.f32 %v3348_v8, %v3330_v49 }
 0x11d   : > { %v633_v53 = vpop.permute.xlu1 %632  ;;  %v931_v44 = vsub.f32 %v485_v17, %v915_v14 }
 0x11e   : > { %v3332_v54 = vpop.permute.xlu0 %836  ;;  %v702_v0 = vadd.f32 %v3339_v58, %v633_v53 }
 0x11f   : > { %v916_v22 = vmul.f32 %v3348_v8, %v3332_v54 }
 0x121   : > { %v638_v56 = vpop.permute.xlu1 %637  ;;  %v932_v55 = vsub.f32 %v486_v24, %v916_v22 }
 0x122   : > { %v3334_v57 = vpop.permute.xlu0 %841  ;;  %v703_v7 = vadd.f32 %v3339_v58, %v638_v56 }
 0x123   : > { %v917_v27 = vmul.f32 %v3348_v8, %v3334_v57 }
 0x125   : > { %v648_v59 = vpop.permute.xlu1 %647  ;;  %v933_v42 = vsub.f32 %v487_v33, %v917_v27 }
 0x126   : > { %v623_v61 = vpop.permute.xlu0 %622  ;;  %v705_v36 = vadd.f32 %v3339_v58, %v648_v59 }
 0x127   : > { %v700_v62 = vadd.f32 %v3339_v58, %v623_v61 }
 0x129   : > { %2672 = vrsqrt.f32 %v700_v62  ;;  %v653_v4 = vpop.permute.xlu1 %652 }
 0x12a   : > { %v628_v5 = vpop.permute.xlu0 %627  ;;  %2674 = vrsqrt.f32 %v702_v0  ;;  %v706_v3 = vadd.f32 %v3339_v58, %v653_v4 }
 0x12b   : > { %v701_v6 = vadd.f32 %v3339_v58, %v628_v5 }
 0x12d   : > { %2676 = vrsqrt.f32 %v701_v6  ;;  %v658_v12 = vpop.permute.xlu1 %657 }
 0x12e   : > { %v643_v13 = vpop.permute.xlu0 %642  ;;  %2678 = vrsqrt.f32 %v703_v7  ;;  %v707_v60 = vadd.f32 %v3339_v58, %v658_v12  ;;  %v491_v7 = vld [vmem:[%s3355_s16 + $0x30] sm:$0xff] }
 0x12f   : > { %v704_v21 = vadd.f32 %v3339_v58, %v643_v13 }
 0x131   : > { %v3359_v63 = vpop.permute.xlu1 %662  ;;  %2680 = vrsqrt.f32 %v704_v21 }
 0x132   : > { %v3361_v15 = vpop.permute.xlu0 %846  ;;  %2682 = vrsqrt.f32 %v705_v36  ;;  %v708_v6 = vadd.f32 %v3339_v58, %v3359_v63 }
 0x133   : > { %v2673_v18 = vpop.eup %2672  ;;  %v918_v38 = vmul.f32 %v3348_v8, %v3361_v15  ;;  %2684 = vrsqrt.f32 %v706_v3 }
 0x134   : > { %v3367_v23 = vmul.f32 %v2673_v18, %v735_v1  ;;  %v2675_v32 = vpop.eup %2674  ;;  %2686 = vrsqrt.f32 %v707_v60 }
 0x135   : > { %v3372_v28 = vpop.permute.xlu1 %667  ;;  %v934_v50 = vsub.f32 %v488_v43, %v918_v38  ;;  %2688 = vrsqrt.f32 %v708_v6 }
 0x136   : > { %v745_v30 = vpop.permute.xlu0 %744  ;;  %v3376_v34 = vmul.f32 %v931_v44, %v3367_v23  ;;  %v709_v22 = vadd.f32 %v3339_v58, %v3372_v28  ;;  %v492_v44 = vld [vmem:[%s3355_s16 + $0x38] sm:$0xff] }
 0x137   : > { %v2677_v52 = vpop.eup %2676  ;;  %v3379_v37 = vmul.f32 %v2675_v32, %v745_v30 }
 0x138   : > { %2201 = vmatprep.mubr.f32.mxu0 %v3376_v34  ;;  %v3385_v39 = vmul.f32 %v2677_v52, %v3328_v10  ;;  %v2679_v41 = vpop.eup %2678  ;;  %2690 = vrsqrt.f32 %v709_v22 }
 0x139   : > { %v750_v16 = vpop.permute.xlu1 %749  ;;  %v3396_v47 = vmul.f32 %v933_v42, %v3379_v37  ;;  %v493_v42 = vld [vmem:[%s3355_s16 + $0x40] sm:$0xff] }
 0x13a   : > { %v3388_v45 = vpop.permute.xlu0 %851  ;;  %v3390_v29 = vmul.f32 %v2679_v41, %v750_v16  ;;  %v3393_v46 = vmul.f32 %v932_v55, %v3385_v39 }
 0x13b   : > { %v919_v2 = vmul.f32 %v3348_v8, %v3388_v45  ;;  %v2681_v10 = vpop.eup %2680 }
 0x13c   : > { %2202 = vmatmul.mubr.f32.vlgmr.msra.gmra.mrb[0].mxu0 %v3393_v46  ;;  %v3403_v1 = vmul.f32 %v934_v50, %v3390_v29  ;;  %v2683_v53 = vpop.eup %2682 }
 0x13d   : > { %v673_v48 = vpop.permute.xlu1 %672  ;;  %2204 = vmatprep.mubr.f32.mxu0 %v3396_v47  ;;  %v935_v20 = vsub.f32 %v489_v9, %v919_v2  ;;  %v2685_v12 = vpop.eup %2684 }
 0x13e   : > { %v3400_v51 = vpop.permute.xlu0 %856  ;;  %v2687_v63 = vpop.eup %2686  ;;  %v710_v52 = vadd.f32 %v3339_v58, %v673_v48 }
 0x13f   : > { %v920_v25 = vmul.f32 %v3348_v8, %v3400_v51  ;;  %v2689_v43 = vpop.eup %2688 }
 0x140   : > { %2205 = vmatmul.mubr.f32.gmra.mrb[2].mxu0 %v3403_v1  ;;  %2692 = vrsqrt.f32 %v710_v52 }
 0x141   : > { %v678_v11 = vpop.permute.xlu1 %677  ;;  %v936_v59 = vsub.f32 %v490_v26, %v920_v25 }
 0x142   : > { %v755_v19 = vpop.permute.xlu0 %754  ;;  %v711_v41 = vadd.f32 %v3339_v58, %v678_v11 }
 0x143   : > { %v3412_v31 = vmul.f32 %v2681_v10, %v755_v19  ;;  %v494_v10 = vld [vmem:[%s3355_s16 + $0x48] sm:$0xff] }
 0x144   : > { %2694 = vrsqrt.f32 %v711_v41  ;;  %v497_v41 = vld [vmem:[%s3355_s16 + $0x60] sm:$0xff] }
 0x145   : > { %v3417_v35 = vmul.f32 %v935_v20, %v3412_v31  ;;  %v760_v40 = vpop.permute.xlu1 %759  ;;  %v2691_v20 = vpop.eup %2690 }
 0x146   : > { %v3419_v56 = vpop.permute.xlu0 %861  ;;  %v3421_v61 = vmul.f32 %v2683_v53, %v760_v40 }
 0x147   : > { %2207 = vmatprep.mubr.f32.mxu0 %v3417_v35  ;;  %v921_v5 = vmul.f32 %v3348_v8, %v3419_v56 }
 0x148   : > { %v3425_v62 = vmul.f32 %v936_v59, %v3421_v61  ;;  %v495_v59 = vld [vmem:[%s3355_s16 + $0x50] sm:$0xff] }
 0x149   : > { %v683_v0 = vpop.permute.xlu1 %682  ;;  %v937_v17 = vsub.f32 %v491_v7, %v921_v5 }
 0x14a   : > { %v3427_v4 = vpop.permute.xlu0 %866  ;;  %2208 = vmatmul.mubr.f32.gmra.mrb[4].mxu0 %v3425_v62  ;;  %v712_v9 = vadd.f32 %v3339_v58, %v683_v0  ;;  %v2693_v5 = vpop.eup %2692 }
 0x14b   : > { %v922_v18 = vmul.f32 %v3348_v8, %v3427_v4 }
 0x14c   : > { %2696 = vrsqrt.f32 %v712_v9 }
 0x14d   : > { %v688_v13 = vpop.permute.xlu1 %687  ;;  %v938_v32 = vsub.f32 %v492_v44, %v922_v18  ;;  %v496_v18 = vld [vmem:[%s3355_s16 + $0x58] sm:$0xff] }
 0x14e   : > { %v765_v14 = vpop.permute.xlu0 %764  ;;  %v713_v40 = vadd.f32 %v3339_v58, %v688_v13  ;;  %v2695_v44 = vpop.eup %2694 }
 0x14f   : > { %v3437_v21 = vmul.f32 %v2685_v12, %v765_v14 }
 0x150   : > { %2698 = vrsqrt.f32 %v713_v40 }
 0x151   : > { %v3443_v24 = vmul.f32 %v937_v17, %v3437_v21  ;;  %v770_v27 = vpop.permute.xlu1 %769 }
 0x152   : > { %v3445_v30 = vpop.permute.xlu0 %871  ;;  %v3447_v33 = vmul.f32 %v2687_v63, %v770_v27 }
 0x153   : > { %2210 = vmatprep.mubr.f32.mxu0 %v3443_v24  ;;  %v923_v38 = vmul.f32 %v3348_v8, %v3445_v30 }
 0x154   : > { %v3452_v36 = vmul.f32 %v938_v32, %v3447_v33 }
 0x155   : > { %v693_v28 = vpop.permute.xlu1 %692  ;;  %v939_v48 = vsub.f32 %v493_v42, %v923_v38 }
 0x156   : > { %v3454_v55 = vpop.permute.xlu0 %876  ;;  %2211 = vmatmul.mubr.f32.gmra.mrb[6].mxu0 %v3452_v36  ;;  %v714_v13 = vadd.f32 %v3339_v58, %v693_v28 }
 0x157   : > { %v924_v2 = vmul.f32 %v3348_v8, %v3454_v55 }
 0x158   : > { %2700 = vrsqrt.f32 %v714_v13 }
 0x159   : > { %v698_v16 = vpop.permute.xlu1 %697  ;;  %v940_v60 = vsub.f32 %v494_v10, %v924_v2 }
 0x15a   : > { %v775_v50 = vpop.permute.xlu0 %774  ;;  %v715_v28 = vadd.f32 %v3339_v58, %v698_v16 }
 0x15b   : > { %v3463_v3 = vmul.f32 %v2689_v43, %v775_v50  ;;  %v2697_v43 = vpop.eup %2696 }
 0x15c   : > { %2702 = vrsqrt.f32 %v715_v28  ;;  %v2699_v16 = vpop.eup %2698 }
 0x15d   : > { %v3468_v19 = vmul.f32 %v939_v48, %v3463_v3  ;;  %v780_v11 = vpop.permute.xlu1 %779 }
 0x15e   : > { %v3470_v25 = vpop.permute.xlu0 %881  ;;  %v3472_v26 = vmul.f32 %v2691_v20, %v780_v11  ;;  %v498_v20 = vld [vmem:[%s3355_s16 + $0x68] sm:$0xff] }
 0x15f   : > { %3850 = vst [vmem:[#allocation21_spill] sm:$0xff] %v3470_v25  ;;  %v925_v53 = vmul.f32 %v3348_v8, %v3470_v25  ;;  %2213 = vmatprep.mubr.f32.mxu0 %v3468_v19 }
 0x160   : > { %v3480_v0 = vmul.f32 %v940_v60, %v3472_v26 }
 0x161   : > { %v3482_v6 = vpop.permute.xlu1 %886  ;;  %v941_v12 = vsub.f32 %v495_v59, %v925_v53 }
 0x162   : > { %v785_v7 = vpop.permute.xlu0 %784  ;;  %v926_v14 = vmul.f32 %v3348_v8, %v3482_v6  ;;  %2214 = vmatmul.mubr.f32.gmra.mrb[8].mxu0 %v3480_v0 }
 0x163   : > { %v3487_v17 = vmul.f32 %v2693_v5, %v785_v7  ;;  %v499_v5 = vld [vmem:[%s3355_s16 + $0x70] sm:$0xff] }
 0x164   : > { %v942_v32 = vsub.f32 %v496_v18, %v926_v14 }
 0x165   : > { %3851 = vst [vmem:[#allocation22_spill] sm:$0xff] %v3487_v17  ;;  %v3492_v22 = vmul.f32 %v941_v12, %v3487_v17  ;;  %v790_v63 = vpop.permute.xlu1 %789  ;;  %v2701_v12 = vpop.eup %2700  ;;  %v1649_v17 = vld [vmem:[#allocation8 + $0x30] sm:$0xff] }
 0x166   : > { %v3494_v27 = vpop.permute.xlu0 %891  ;;  %v3496_v52 = vmul.f32 %v2695_v44, %v790_v63  ;;  %v2703_v28 = vpop.eup %2702 }
 0x167   : > { %3852 = vst [vmem:[#allocation23_spill] sm:$0xff] %v3492_v22  ;;  %3853 = vst [vmem:[#allocation24_spill] sm:$0xff] %v3494_v27  ;;  %v927_v38 = vmul.f32 %v3348_v8, %v3494_v27  ;;  %2216 = vmatprep.mubr.f32.mxu0 %v3492_v22  ;;  %v1648_v27 = vld [vmem:[#allocation8 + $0x28] sm:$0xff] }
 0x168   : > { %3854 = vst [vmem:[#allocation25_spill] sm:$0xff] %v3496_v52  ;;  %v3504_v42 = vmul.f32 %v942_v32, %v3496_v52  ;;  %v500_v32 = vld [vmem:[%s3355_s16 + $0x78] sm:$0xff]  ;;  %s2931_s16 = smov [#allocation10]  }
 0x169   : > { %v3506_v50 = vpop.permute.xlu1 %896  ;;  %v943_v2 = vsub.f32 %v497_v41, %v927_v38  ;;  %v1650_v52 = vld [vmem:[#allocation8 + $0x38] sm:$0xff]  ;;  %s2852_s19 = sshll.u32 %s2931_s16, 4  ;;  %s2853_s19 = int_to_ptr.vmem [resolvable:$false] %s2852_s19 }
 0x16a   : > { %3855 = vst [vmem:[#allocation26_spill] sm:$0xff] %v3504_v42  ;;  %3856 = vst [vmem:[#allocation27_spill] sm:$0xff] %v3506_v50  ;;  %v795_v48 = vpop.permute.xlu0 %794  ;;  %v928_v9 = vmul.f32 %v3348_v8, %v3506_v50  ;;  %2217 = vmatmul.mubr.f32.gmra.mrb[10].mxu0 %v3504_v42  ;;  %v2501_v22 = vpack.c.bf16 %v1650_v52, %v1649_v17  ;;  %v1653_v42 = vld [vmem:[#allocation8 + $0x50] sm:$0xff]  ;;  %v2034_v17 = vld [vmem:[%s3802_s10] ss:$0 sm:$0xff]  ;;  %s2854_s12 = scalar_lea.vmem %s2853_s19, 4096  ;;  %p2855_p6 = scmp.lt.s32.totalorder %s3744_s17, %s2853_s19 }
 0x16b   : > { %v3511_v10 = vmul.f32 %v2697_v43, %v795_v48  ;;  %p2856_p9 = scmp.lt.s32.totalorder %s2854_s12, %s2848_s14 }
 0x16c   : > { %v944_v53 = vsub.f32 %v498_v20, %v928_v9  ;;  %v1275_v9 = vld [vmem:[#allocation5 + $0x48] sm:$0xff] }
 0x16d   : > { %3857 = vst [vmem:[#allocation28_spill] sm:$0xff] %v3511_v10  ;;  %v3515_v58 = vmul.f32 %v943_v2, %v3511_v10  ;;  %v800_v11 = vpop.permute.xlu1 %799  ;;  %p2857_p5 = por %p2856_p9, %p2855_p6 }
 0x16e   : > { %v3517_v60 = vpop.permute.xlu0 %901  ;;  %v3519_v40 = vmul.f32 %v2699_v16, %v800_v11  ;;  %v1276_v16 = vld [vmem:[#allocation5 + $0x50] sm:$0xff]  ;;  %v1277_v11 = vld [vmem:[#allocation5 + $0x58] sm:$0xff] }
 0x16f   : > { %3858 = vst [vmem:[#allocation29_spill] sm:$0xff] %v3515_v58  ;;  %3859 = vst [vmem:[#allocation30_spill] sm:$0xff] %v3517_v60  ;;  %v929_v59 = vmul.f32 %v3348_v8, %v3517_v60  ;;  %2219 = vmatprep.mubr.f32.mxu0 %v3515_v58  ;;  %p2858_p0 = pnand %p2857_p5, %p2851_p1 }
 0x170   : > { %3860 = vst [vmem:[#allocation31_spill] sm:$0xff] %v3519_v40  ;;  %v3526_v7 = vmul.f32 %v944_v53, %v3519_v40  ;;  %v2445_v53 = vpack.c.bf16 %v1277_v11, %v1276_v16  ;;  %v1439_v16 = vld [vmem:[#allocation7 + $0x28] sm:$0xff] }
 0x171   : > { %v3528_v14 = vpop.permute.xlu1 %906  ;;  %v945_v18 = vsub.f32 %v499_v5, %v929_v59  ;;  %v1278_v59 = vld [vmem:[#allocation5 + $0x60] sm:$0xff]  ;;  %v1279_v5 = vld [vmem:[#allocation5 + $0x68] sm:$0xff] }
 0x172   : > { %3861 = vst [vmem:[#allocation32_spill] sm:$0xff] %v3526_v7  ;;  %3862 = vst [vmem:[#allocation33_spill] sm:$0xff] %v3528_v14  ;;  %v805_v13 = vpop.permute.xlu0 %804  ;;  %v930_v44 = vmul.f32 %v3348_v8, %v3528_v14  ;;  %2220 = vmatmul.mubr.f32.gmra.mrb[12].mxu0 %v3526_v7  ;;  %v1274_v8 = vld [vmem:[#allocation5 + $0x40] sm:$0xff] }
 0x173   : > { %v3533_v63 = vmul.f32 %v2701_v12, %v805_v13  ;;  %v2441_v20 = vpack.c.bf16 %v1275_v9, %v1274_v8  ;;  %v2449_v12 = vpack.c.bf16 %v1279_v5, %v1278_v59  ;;  %v1280_v13 = vld [vmem:[#allocation5 + $0x70] sm:$0xff]  ;;  %v1437_v8 = vld [vmem:[#allocation7 + $0x18] sm:$0xff]  ;;  %v1647_v7 = vld [vmem:[#allocation8 + $0x20] sm:$0xff] }
 0x174   : > { %v946_v43 = vsub.f32 %v500_v32, %v930_v44  ;;  %v1434_v32 = vld [vmem:[#allocation7] sm:$0xff]  ;;  %v1441_v59 = vld [vmem:[#allocation7 + $0x38] sm:$0xff]  ;;  %v2497_v50 = vpack.c.bf16 %v1648_v27, %v1647_v7 }
 0x175   : > { %3863 = vst [vmem:[#allocation34_spill] sm:$0xff] %v3533_v63  ;;  %v3537_v38 = vmul.f32 %v945_v18, %v3533_v63  ;;  %v810_v41 = vpop.permute.xlu1 %809  ;;  %2442 = vmatprep.subr.bf16.mxu1 %v2441_v20  ;;  %v1281_v18 = vld [vmem:[#allocation5 + $0x78] sm:$0xff] }
 0x176   : > { %v3539_v48 = vmul.f32 %v2703_v28, %v810_v41  ;;  %2444 = vmatpush3.bf16.msra.mxu1 %v2441_v20  ;;  %v2453_v44 = vpack.c.bf16 %v1281_v18, %v1280_v13  ;;  %v1435_v28 = vld [vmem:[#allocation7 + $0x8] sm:$0xff]  ;;  %v1436_v41 = vld [vmem:[#allocation7 + $0x10] sm:$0xff]  ;;  %v1438_v20 = vld [vmem:[#allocation7 + $0x20] sm:$0xff] }
 0x177   : > { %3864 = vst [vmem:[#allocation35_spill] sm:$0xff] %v3537_v38  ;;  %2222 = vmatprep.mubr.f32.mxu0 %v3537_v38  ;;  %2446 = vmatprep.subr.bf16.mxu1 %v2445_v53  ;;  %v2461_v9 = vpack.c.bf16 %v1437_v8, %v1436_v41  ;;  %v2465_v11 = vpack.c.bf16 %v1439_v16, %v1438_v20  ;;  %v1443_v13 = vld [vmem:[#allocation7 + $0x48] sm:$0xff]  ;;  %v1446_v41 = vld [vmem:[#allocation7 + $0x60] sm:$0xff]  ;;  %v983_v20 = vpop.permute.xlu0 %982 }
 0x178   : > { %3865 = vst [vmem:[#allocation36_spill] sm:$0xff] %v3539_v48  ;;  %v3543_v2 = vmul.f32 %v946_v43, %v3539_v48  ;;  %v2457_v43 = vpack.c.bf16 %v1435_v28, %v1434_v32  ;;  %v1445_v32 = vld [vmem:[#allocation7 + $0x58] sm:$0xff]  ;;  %v1447_v8 = vld [vmem:[#allocation7 + $0x68] sm:$0xff]  ;;  %v3549_v16 = vld [vmem:[%s3797_s5] ss:$0 sm:$0xff] }
 0x17a   : > { %3866 = vst [vmem:[#allocation37_spill] sm:$0xff] %v3543_v2  ;;  %2223 = vmatmul.mubr.f32.gmra.mrb[14].mxu0 %v3543_v2  ;;  %2448 = vmatpush3.bf16.msra.mxu1 %v2445_v53  ;;  %v1440_v53 = vld [vmem:[#allocation7 + $0x30] sm:$0xff] }
 0x17b   : > { %2450 = vmatprep.subr.bf16.mxu1 %v2449_v12  ;;  %2458 = vmatprep.subr.bf16.mxu0 %v2457_v43  ;;  %v2469_v5 = vpack.c.bf16 %v1441_v59, %v1440_v53  ;;  %v1066_v53 = vmul.f32 %v3549_v16, %v983_v20 }
 0x17c   : > { %2460 = vmatpush3.bf16.msra.mxu0 %v2457_v43  ;;  %v2481_v43 = vpack.c.bf16 %v1447_v8, %v1446_v41 }
 0x17d   : > { %2462 = vmatprep.subr.bf16.mxu0 %v2461_v9 }
 0x17e   : > { %2452 = vmatpush3.bf16.msra.mxu1 %v2449_v12  ;;  %v1442_v12 = vld [vmem:[#allocation7 + $0x40] sm:$0xff] }
 0x17f   : > { %2454 = vmatprep.subr.bf16.mxu1 %v2453_v44  ;;  %v2473_v18 = vpack.c.bf16 %v1443_v13, %v1442_v12  ;;  %v3556_v12 = vld [vmem:[%s3798_s6] ss:$0 sm:$0xff]  ;;  %v993_v13 = vpop.permute.xlu0 %992 }
 0x180   : > { %2464 = vmatpush3.bf16.msra.mxu0 %v2461_v9  ;;  %v988_v9 = vpop.permute.xlu1 %987  ;;  %v1068_v8 = vmul.f32 %v3549_v16, %v993_v13 }
 0x181   : > { %2466 = vmatprep.subr.bf16.mxu0 %v2465_v11 }
 0x182   : > { %2456 = vmatpush3.bf16.msra.mxu1 %v2453_v44  ;;  %v1444_v44 = vld [vmem:[#allocation7 + $0x50] sm:$0xff] }
 0x183   : > { %v2477_v28 = vpack.c.bf16 %v1445_v32, %v1444_v44 }
 0x184   : > { %2468 = vmatpush3.bf16.msra.mxu0 %v2465_v11  ;;  %v1067_v11 = vmul.f32 %v3549_v16, %v988_v9  ;;  %v998_v59 = vpop.permute.xlu1 %997 }
 0x185   : > { %2470 = vmatprep.subr.bf16.mxu0 %v2469_v5 }
 0x188   : > { %2472 = vmatpush3.bf16.msra.mxu0 %v2469_v5 }
 0x189   : > { %2474 = vmatprep.subr.bf16.mxu0 %v2473_v18 }
 0x18c   : > { %2476 = vmatpush3.bf16.msra.mxu0 %v2473_v18 }
 0x18d   : > { %2478 = vmatprep.subr.bf16.mxu0 %v2477_v28 }
 0x190   : > { %2480 = vmatpush3.bf16.msra.mxu0 %v2477_v28  ;;  %v1069_v28 = vmul.f32 %v3549_v16, %v998_v59 }
 0x191   : > { %2482 = vmatprep.subr.bf16.mxu0 %v2481_v43 }
 0x194   : > { %2484 = vmatpush3.bf16.msra.mxu0 %v2481_v43 }
 0x20f   : > { %v2203_v5 = vpop.f32.mrb[0].mxu0 }
 0x210   : > { %v1154_v18 = vadd.f32 %v2203_v5, %v1067_v11  ;;  %v1148_v44 = vpop.f32.mrb[1].mxu0  ;;  %v1008_v5 = vpop.permute.xlu1 %1007 }
 0x211   : > { %v1149_v32 = vadd.f32 %v1148_v44, %v1066_v53  ;;  %v1003_v53 = vpop.permute.xlu0 %1002  ;;  %v1071_v59 = vmul.f32 %v3549_v16, %v1008_v5 }
 0x212   : > { %v1235_v41 = vadd.f32 %v3556_v12, %v1154_v18  ;;  %v1070_v13 = vmul.f32 %v3549_v16, %v1003_v53 }
 0x213   : > { %v1234_v43 = vadd.f32 %v3556_v12, %v1149_v32  ;;  %v2206_v9 = vpop.f32.mrb[2].mxu0 }
 0x214   : > { %v1164_v20 = vadd.f32 %v2206_v9, %v1069_v28  ;;  %v1158_v63 = vpop.f32.mrb[3].mxu0  ;;  %v1018_v9 = vpop.permute.xlu1 %1017 }
 0x215   : > { %2704 = vtanh.f32 %v1234_v43  ;;  %v1159_v48 = vadd.f32 %v1158_v63, %v1068_v8 }
 0x216   : > { %2706 = vtanh.f32 %v1235_v41  ;;  %v1237_v38 = vadd.f32 %v3556_v12, %v1164_v20  ;;  %v1013_v20 = vpop.permute.xlu0 %1012 }
 0x217   : > { %v1236_v11 = vadd.f32 %v3556_v12, %v1159_v48  ;;  %v1072_v5 = vmul.f32 %v3549_v16, %v1013_v20 }
 0x219   : > { %2708 = vtanh.f32 %v1236_v11  ;;  %v1073_v11 = vmul.f32 %v3549_v16, %v1018_v9 }
 0x21a   : > { %2710 = vtanh.f32 %v1237_v38  ;;  %v1023_v9 = vpop.permute.xlu0 %1022 }
 0x21d   : > { %v2209_v18 = vpop.f32.mrb[4].mxu0 }
 0x21e   : > { %v1174_v44 = vadd.f32 %v2209_v18, %v1071_v59  ;;  %v1168_v32 = vpop.f32.mrb[5].mxu0 }
 0x21f   : > { %v3566_v28 = vpop.eup %2704  ;;  %v1169_v43 = vadd.f32 %v1168_v32, %v1070_v13 }
 0x220   : > { %v3568_v63 = vpop.eup %2706  ;;  %v1239_v41 = vadd.f32 %v3556_v12, %v1174_v44  ;;  %2257 = vmatprep.mubr.f32.mxu1 %v3566_v28 }
 0x221   : > { %v1238_v48 = vadd.f32 %v3556_v12, %v1169_v43  ;;  %2258 = vmatmul.mubr.f32.vlgmr.msra.gmra.mrb[0].mxu1 %v3568_v63 }
 0x223   : > { %v3574_v38 = vpop.eup %2708  ;;  %2712 = vtanh.f32 %v1238_v48  ;;  %v1028_v48 = vpop.permute.xlu1 %1027 }
 0x224   : > { %v3576_v8 = vpop.eup %2710  ;;  %2714 = vtanh.f32 %v1239_v41  ;;  %2260 = vmatprep.mubr.f32.mxu1 %v3574_v38  ;;  %v1075_v20 = vmul.f32 %v3549_v16, %v1028_v48 }
 0x225   : > { %2261 = vmatmul.mubr.f32.gmra.mrb[2].mxu1 %v3576_v8 }
 0x227   : > { %v1038_v60 = vpop.permute.xlu1 %1037 }
 0x228   : > { %v1077_v48 = vmul.f32 %v3549_v16, %v1038_v60 }
 0x229   : > { %v2212_v53 = vpop.f32.mrb[6].mxu0 }
 0x22a   : > { %v1184_v59 = vadd.f32 %v2212_v53, %v1073_v11  ;;  %v1178_v13 = vpop.f32.mrb[7].mxu0  ;;  %v1074_v11 = vmul.f32 %v3549_v16, %v1023_v9 }
 0x22b   : > { %v1179_v18 = vadd.f32 %v1178_v13, %v1072_v5 }
 0x22c   : > { %v1241_v44 = vadd.f32 %v3556_v12, %v1184_v59 }
 0x22d   : > { %v3583_v32 = vpop.eup %2712  ;;  %v1240_v43 = vadd.f32 %v3556_v12, %v1179_v18 }
 0x22e   : > { %v3586_v41 = vpop.eup %2714  ;;  %2263 = vmatprep.mubr.f32.mxu1 %v3583_v32 }
 0x22f   : > { %2716 = vtanh.f32 %v1240_v43  ;;  %2264 = vmatmul.mubr.f32.gmra.mrb[4].mxu1 %v3586_v41 }
 0x230   : > { %2718 = vtanh.f32 %v1241_v44  ;;  %v1033_v44 = vpop.permute.xlu0 %1032 }
 0x231   : > { %v1076_v9 = vmul.f32 %v3549_v16, %v1033_v44 }
 0x234   : > { %v1043_v40 = vpop.permute.xlu0 %1042 }
 0x235   : > { %v2215_v5 = vpop.f32.mrb[8].mxu0  ;;  %v1078_v60 = vmul.f32 %v3549_v16, %v1043_v40 }
 0x236   : > { %v1194_v53 = vadd.f32 %v2215_v5, %v1075_v20  ;;  %v1188_v59 = vpop.f32.mrb[9].mxu0 }
 0x237   : > { %v1189_v13 = vadd.f32 %v1188_v59, %v1074_v11 }
 0x238   : > { %v1243_v18 = vadd.f32 %v3556_v12, %v1194_v53 }
 0x239   : > { %v3593_v2 = vpop.eup %2716  ;;  %v1242_v43 = vadd.f32 %v3556_v12, %v1189_v13  ;;  %v1048_v13 = vpop.permute.xlu1 %1047 }
 0x23a   : > { %v3596_v14 = vpop.eup %2718  ;;  %2266 = vmatprep.mubr.f32.mxu1 %v3593_v2 }
 0x23b   : > { %2720 = vtanh.f32 %v1242_v43  ;;  %2267 = vmatmul.mubr.f32.gmra.mrb[6].mxu1 %v3596_v14  ;;  %v1079_v43 = vmul.f32 %v3549_v16, %v1048_v13 }
 0x23c   : > { %2722 = vtanh.f32 %v1243_v18 }
 0x23d   : > { %v2218_v20 = vpop.f32.mrb[10].mxu0 }
 0x23e   : > { %v1204_v11 = vadd.f32 %v2218_v20, %v1077_v48  ;;  %v1198_v5 = vpop.f32.mrb[11].mxu0 }
 0x23f   : > { %v1199_v53 = vadd.f32 %v1198_v5, %v1076_v9 }
 0x240   : > { %v1245_v59 = vadd.f32 %v3556_v12, %v1204_v11 }
 0x241   : > { %v1244_v10 = vadd.f32 %v3556_v12, %v1199_v53  ;;  %v1053_v53 = vpop.permute.xlu0 %1052 }
 0x242   : > { %v1080_v13 = vmul.f32 %v3549_v16, %v1053_v53 }
 0x243   : > { %2724 = vtanh.f32 %v1244_v10  ;;  %v1058_v10 = vpop.permute.xlu1 %1057 }
 0x244   : > { %2726 = vtanh.f32 %v1245_v59  ;;  %v1081_v59 = vmul.f32 %v3549_v16, %v1058_v10 }
 0x245   : > { %v3605_v58 = vpop.eup %2720  ;;  %v2221_v18 = vpop.f32.mrb[12].mxu0 }
 0x246   : > { %v3608_v44 = vpop.eup %2722  ;;  %v1214_v48 = vadd.f32 %v2221_v18, %v1079_v43  ;;  %v1208_v20 = vpop.f32.mrb[13].mxu0  ;;  %2269 = vmatprep.mubr.f32.mxu1 %v3605_v58 }
 0x247   : > { %v1209_v9 = vadd.f32 %v1208_v20, %v1078_v60  ;;  %2270 = vmatmul.mubr.f32.gmra.mrb[8].mxu1 %v3608_v44 }
 0x248   : > { %v1247_v11 = vadd.f32 %v3556_v12, %v1214_v48 }
 0x249   : > { %v1246_v5 = vadd.f32 %v3556_v12, %v1209_v9 }
 0x24b   : > { %2728 = vtanh.f32 %v1246_v5 }
 0x24c   : > { %2730 = vtanh.f32 %v1247_v11 }
 0x24d   : > { %v3615_v40 = vpop.eup %2724  ;;  %v2224_v43 = vpop.f32.mrb[14].mxu0 }
 0x24e   : > { %v3618_v18 = vpop.eup %2726  ;;  %v1224_v60 = vadd.f32 %v2224_v43, %v1081_v59  ;;  %v1218_v20 = vpop.f32.mrb[15].mxu0  ;;  %2272 = vmatprep.mubr.f32.mxu1 %v3615_v40  ;;  %v1448_v59 = vld [vmem:[#allocation7 + $0x70] sm:$0xff]  ;;  %v1643_v43 = vld [vmem:[#allocation8] sm:$0xff] }
 0x24f   : > { %v1219_v48 = vadd.f32 %v1218_v20, %v1080_v13  ;;  %2273 = vmatmul.mubr.f32.gmra.mrb[10].mxu1 %v3618_v18  ;;  %v1645_v20 = vld [vmem:[#allocation8 + $0x10] sm:$0xff] }
 0x250   : > { %v1249_v9 = vadd.f32 %v3556_v12, %v1224_v60  ;;  %v1644_v60 = vld [vmem:[#allocation8 + $0x8] sm:$0xff] }
 0x251   : > { %v1248_v5 = vadd.f32 %v3556_v12, %v1219_v48  ;;  %v1449_v12 = vld [vmem:[#allocation7 + $0x78] sm:$0xff]  ;;  %v2489_v48 = vpack.c.bf16 %v1644_v60, %v1643_v43 }
 0x252   : > { %v2485_v13 = vpack.c.bf16 %v1449_v12, %v1448_v59  ;;  %v1651_v59 = vld [vmem:[#allocation8 + $0x40] sm:$0xff]  ;;  %v1652_v12 = vld [vmem:[#allocation8 + $0x48] sm:$0xff]  ;;  %v1654_v43 = vld [vmem:[#allocation8 + $0x58] sm:$0xff] }
 0x253   : > { %2732 = vtanh.f32 %v1248_v5  ;;  %2490 = vmatprep.subr.bf16.mxu1 %v2489_v48  ;;  %v2509_v60 = vpack.c.bf16 %v1654_v43, %v1653_v42 }
 0x254   : > { %2734 = vtanh.f32 %v1249_v9  ;;  %2486 = vmatprep.subr.bf16.mxu0 %v2485_v13  ;;  %v1646_v9 = vld [vmem:[#allocation8 + $0x18] sm:$0xff]  ;;  %2492 = vmatpush3.bf16.msra.mxu1 %v2489_v48 }
 0x255   : > { %v3624_v11 = vpop.eup %2728  ;;  %2488 = vmatpush3.bf16.msra.mxu0 %v2485_v13  ;;  %v2493_v5 = vpack.c.bf16 %v1646_v9, %v1645_v20  ;;  %v2505_v13 = vpack.c.bf16 %v1652_v12, %v1651_v59  ;;  %v1655_v20 = vld [vmem:[#allocation8 + $0x60] sm:$0xff]  ;;  %v1656_v9 = vld [vmem:[#allocation8 + $0x68] sm:$0xff] }
 0x256   : > { %v3626_v10 = vpop.eup %2730  ;;  %2275 = vmatprep.mubr.f32.mxu1 %v3624_v11  ;;  %v2513_v27 = vpack.c.bf16 %v1656_v9, %v1655_v20 }
 0x257   : > { %2276 = vmatmul.mubr.f32.gmra.mrb[12].mxu1 %v3626_v10  ;;  %2494 = vmatprep.subr.bf16.mxu1 %v2493_v5 }
 0x258   : > { %2496 = vmatpush3.bf16.msra.mxu1 %v2493_v5 }
 0x259   : > { %2498 = vmatprep.subr.bf16.mxu1 %v2497_v50 }
 0x25c   : > { %2500 = vmatpush3.bf16.msra.mxu1 %v2497_v50 }
 0x25d   : > { %v3630_v16 = vpop.eup %2732  ;;  %2502 = vmatprep.subr.bf16.mxu1 %v2501_v22 }
 0x25e   : > { %v3632_v53 = vpop.eup %2734  ;;  %2278 = vmatprep.mubr.f32.mxu1 %v3630_v16 }
 0x25f   : > { %2279 = vmatmul.mubr.f32.gmra.mrb[14].mxu1 %v3632_v53 }
 0x260   : > { %2504 = vmatpush3.bf16.msra.mxu1 %v2501_v22 }
 0x261   : > { %2506 = vmatprep.subr.bf16.mxu1 %v2505_v13 }
 0x264   : > { %2508 = vmatpush3.bf16.msra.mxu1 %v2505_v13 }
 0x265   : > { %2510 = vmatprep.subr.bf16.mxu1 %v2509_v60 }
 0x268   : > { %2512 = vmatpush3.bf16.msra.mxu1 %v2509_v60 }
 0x269   : > { %2514 = vmatprep.subr.bf16.mxu1 %v2513_v27 }
 0x26c   : > { %2516 = vmatpush3.bf16.msra.mxu1 %v2513_v27 }
 0x2f4   : > { %v2259_v52 = vpop.f32.mrb[0].mxu1 }
 0x2f5   : > { %v1355_v50 = vpop.f32.mrb[1].mxu1  ;;  %v1361_v48 = vadd.f32 %v2259_v52, %v2034_v17 }
 0x2f6   : > { %v1356_v7 = vadd.f32 %v2034_v17, %v1355_v50 }
 0x2f8   : > { %v2262_v5 = vpop.f32.mrb[2].mxu1  ;;  %2313 = vmatprep.mubr.f32.mxu0 %v1356_v7 }
 0x2f9   : > { %v1365_v22 = vpop.f32.mrb[3].mxu1  ;;  %2314 = vmatmul.mubr.f32.vlgmr.msra.gmra.mrb[16].mxu0 %v1361_v48  ;;  %v1371_v59 = vadd.f32 %v2262_v5, %v2034_v17 }
 0x2fa   : > { %v1366_v42 = vadd.f32 %v2034_v17, %v1365_v22 }
 0x2fc   : > { %2316 = vmatprep.mubr.f32.mxu0 %v1366_v42 }
 0x2fd   : > { %2317 = vmatmul.mubr.f32.gmra.mrb[18].mxu0 %v1371_v59 }
 0x302   : > { %v2265_v12 = vpop.f32.mrb[4].mxu1 }
 0x303   : > { %v1375_v13 = vpop.f32.mrb[5].mxu1  ;;  %v1381_v60 = vadd.f32 %v2265_v12, %v2034_v17 }
 0x304   : > { %v1376_v43 = vadd.f32 %v2034_v17, %v1375_v13 }
 0x306   : > { %2319 = vmatprep.mubr.f32.mxu0 %v1376_v43 }
 0x307   : > { %2320 = vmatmul.mubr.f32.gmra.mrb[20].mxu0 %v1381_v60 }
 0x30e   : > { %v2268_v20 = vpop.f32.mrb[6].mxu1 }
 0x30f   : > { %v1385_v9 = vpop.f32.mrb[7].mxu1  ;;  %v1391_v25 = vadd.f32 %v2268_v20, %v2034_v17 }
 0x310   : > { %v1386_v27 = vadd.f32 %v2034_v17, %v1385_v9 }
 0x312   : > { %2322 = vmatprep.mubr.f32.mxu0 %v1386_v27 }
 0x313   : > { %2323 = vmatmul.mubr.f32.gmra.mrb[22].mxu0 %v1391_v25 }
 0x31a   : > { %v2271_v52 = vpop.f32.mrb[8].mxu1 }
 0x31b   : > { %v1395_v50 = vpop.f32.mrb[9].mxu1  ;;  %v1401_v48 = vadd.f32 %v2271_v52, %v2034_v17  ;;  %v1657_v52 = vld [vmem:[#allocation8 + $0x70] sm:$0xff] }
 0x31c   : > { %v1396_v7 = vadd.f32 %v2034_v17, %v1395_v50  ;;  %v1658_v50 = vld [vmem:[#allocation8 + $0x78] sm:$0xff] }
 0x31e   : > { %2325 = vmatprep.mubr.f32.mxu0 %v1396_v7  ;;  %v2517_v7 = vpack.c.bf16 %v1658_v50, %v1657_v52  ;;  %v1599_v52 = vmul.f32 %v3583_v32, %v3583_v32 }
 0x31f   : > { %2326 = vmatmul.mubr.f32.gmra.mrb[24].mxu0 %v1401_v48  ;;  %v1596_v48 = vmul.f32 %v3568_v63, %v3568_v63 }
 0x320   : > { %2518 = vmatprep.subr.bf16.mxu1 %v2517_v7 }
 0x321   : > { %2520 = vmatpush3.bf16.msra.mxu1 %v2517_v7  ;;  %v1615_v7 = vsub.f32 1.0, %v1599_v52 }
 0x322   : > { %v2274_v5 = vpop.f32.mrb[10].mxu1 }
 0x323   : > { %v1405_v22 = vpop.f32.mrb[11].mxu1  ;;  %v1411_v59 = vadd.f32 %v2274_v5, %v2034_v17  ;;  %v1595_v5 = vmul.f32 %v3566_v28, %v3566_v28 }
 0x324   : > { %v1406_v42 = vadd.f32 %v2034_v17, %v1405_v22  ;;  %v1612_v22 = vsub.f32 1.0, %v1596_v48 }
 0x326   : > { %2328 = vmatprep.mubr.f32.mxu0 %v1406_v42  ;;  %v1598_v42 = vmul.f32 %v3576_v8, %v3576_v8  ;;  %v1600_v8 = vmul.f32 %v3586_v41, %v3586_v41 }
 0x327   : > { %2329 = vmatmul.mubr.f32.gmra.mrb[26].mxu0 %v1411_v59 }
 0x32a   : > { %v2277_v12 = vpop.f32.mrb[12].mxu1 }
 0x32b   : > { %v1415_v13 = vpop.f32.mrb[13].mxu1  ;;  %v1421_v60 = vadd.f32 %v2277_v12, %v2034_v17  ;;  %v1611_v12 = vsub.f32 1.0, %v1595_v5 }
 0x32c   : > { %v1416_v43 = vadd.f32 %v2034_v17, %v1415_v13 }
 0x32e   : > { %2331 = vmatprep.mubr.f32.mxu0 %v1416_v43 }
 0x32f   : > { %2332 = vmatmul.mubr.f32.gmra.mrb[28].mxu0 %v1421_v60 }
 0x332   : > { %v2280_v20 = vpop.f32.mrb[14].mxu1 }
 0x333   : > { %v1425_v25 = vpop.f32.mrb[15].mxu1  ;;  %v1431_v27 = vadd.f32 %v2280_v20, %v2034_v17  ;;  %v1614_v20 = vsub.f32 1.0, %v1598_v42  ;;  %v1602_v42 = vmul.f32 %v3596_v14, %v3596_v14 }
 0x334   : > { %v1426_v9 = vadd.f32 %v2034_v17, %v1425_v25  ;;  %v1597_v17 = vmul.f32 %v3574_v38, %v3574_v38  ;;  %v1616_v38 = vsub.f32 1.0, %v1600_v8  ;;  %v1605_v8 = vmul.f32 %v3615_v40, %v3615_v40 }
 0x336   : > { %2334 = vmatprep.mubr.f32.mxu0 %v1426_v9  ;;  %v1613_v9 = vsub.f32 1.0, %v1597_v17 }
 0x337   : > { %2335 = vmatmul.mubr.f32.gmra.mrb[30].mxu0 %v1431_v27 }
 0x3cc   : > { %v2315_v59 = vpop.f32.mrb[16].mxu0 }
 0x3cd   : > { %v1628_v13 = vmul.f32 %v2315_v59, %v1612_v22  ;;  %v1516_v43 = vpop.f32.mrb[17].mxu0  ;;  %v1601_v59 = vmul.f32 %v3593_v2, %v3593_v2 }
 0x3ce   : > { %v1627_v60 = vmul.f32 %v1611_v12, %v1516_v43  ;;  %v1618_v12 = vsub.f32 1.0, %v1602_v42 }
 0x3cf   : > { %v1617_v41 = vsub.f32 1.0, %v1601_v59 }
 0x3d0   : > { %v2318_v25 = vpop.f32.mrb[18].mxu0  ;;  %2369 = vmatprep.mubr.f32.mxu1 %v1627_v60  ;;  %v1604_v60 = vmul.f32 %v3608_v44, %v3608_v44  ;;  %v1621_v44 = vsub.f32 1.0, %v1605_v8 }
 0x3d1   : > { %v1630_v63 = vmul.f32 %v2318_v25, %v1614_v20  ;;  %v1526_v27 = vpop.f32.mrb[19].mxu0  ;;  %2370 = vmatmul.mubr.f32.vlgmr.msra.gmra.mrb[16].mxu1 %v1628_v13  ;;  %v1603_v20 = vmul.f32 %v3605_v58, %v3605_v58 }
 0x3d2   : > { %v1629_v28 = vmul.f32 %v1613_v9, %v1526_v27  ;;  %v1620_v25 = vsub.f32 1.0, %v1604_v60 }
 0x3d3   : > { %v1619_v14 = vsub.f32 1.0, %v1603_v20 }
 0x3d4   : > { %2372 = vmatprep.mubr.f32.mxu1 %v1629_v28  ;;  %v1606_v28 = vmul.f32 %v3618_v18, %v3618_v18 }
 0x3d5   : > { %2373 = vmatmul.mubr.f32.gmra.mrb[18].mxu1 %v1630_v63 }
 0x3d6   : > { %v1622_v52 = vsub.f32 1.0, %v1606_v28 }
 0x3da   : > { %v2321_v50 = vpop.f32.mrb[20].mxu0 }
 0x3db   : > { %v1632_v48 = vmul.f32 %v2321_v50, %v1616_v38  ;;  %v1536_v5 = vpop.f32.mrb[21].mxu0 }
 0x3dc   : > { %v1631_v22 = vmul.f32 %v1615_v7, %v1536_v5  ;;  %v1607_v5 = vmul.f32 %v3624_v11, %v3624_v11 }
 0x3de   : > { %2375 = vmatprep.mubr.f32.mxu1 %v1631_v22  ;;  %v1623_v42 = vsub.f32 1.0, %v1607_v5 }
 0x3df   : > { %2376 = vmatmul.mubr.f32.gmra.mrb[20].mxu1 %v1632_v48  ;;  %v1608_v48 = vmul.f32 %v3626_v10, %v3626_v10  ;;  %v1609_v10 = vmul.f32 %v3630_v16, %v3630_v16 }
 0x3e1   : > { %v1624_v18 = vsub.f32 1.0, %v1608_v48  ;;  %v1625_v11 = vsub.f32 1.0, %v1609_v10 }
 0x3e6   : > { %v2324_v17 = vpop.f32.mrb[22].mxu0 }
 0x3e7   : > { %v1634_v13 = vmul.f32 %v2324_v17, %v1618_v12  ;;  %v1546_v43 = vpop.f32.mrb[23].mxu0  ;;  %v1610_v17 = vmul.f32 %v3632_v53, %v3632_v53 }
 0x3e8   : > { %v1633_v32 = vmul.f32 %v1617_v41, %v1546_v43 }
 0x3e9   : > { %v1626_v41 = vsub.f32 1.0, %v1610_v17 }
 0x3ea   : > { %2378 = vmatprep.mubr.f32.mxu1 %v1633_v32 }
 0x3eb   : > { %2379 = vmatmul.mubr.f32.gmra.mrb[22].mxu1 %v1634_v13 }
 0x3f2   : > { %v2327_v9 = vpop.f32.mrb[24].mxu0 }
 0x3f3   : > { %v1636_v63 = vmul.f32 %v2327_v9, %v1620_v25  ;;  %v1556_v27 = vpop.f32.mrb[25].mxu0 }
 0x3f4   : > { %v1635_v2 = vmul.f32 %v1619_v14, %v1556_v27 }
 0x3f6   : > { %2381 = vmatprep.mubr.f32.mxu1 %v1635_v2 }
 0x3f7   : > { %2382 = vmatmul.mubr.f32.gmra.mrb[24].mxu1 %v1636_v63 }
 0x3fa   : > { %v2330_v38 = vpop.f32.mrb[26].mxu0 }
 0x3fb   : > { %v1638_v50 = vmul.f32 %v2330_v38, %v1622_v52  ;;  %v1566_v7 = vpop.f32.mrb[27].mxu0 }
 0x3fc   : > { %v1637_v58 = vmul.f32 %v1621_v44, %v1566_v7 }
 0x3fe   : > { %2384 = vmatprep.mubr.f32.mxu1 %v1637_v58 }
 0x3ff   : > { %2385 = vmatmul.mubr.f32.gmra.mrb[26].mxu1 %v1638_v50 }
 0x402   : > { %v2333_v22 = vpop.f32.mrb[28].mxu0 }
 0x403   : > { %v1640_v40 = vmul.f32 %v2333_v22, %v1624_v18  ;;  %v1576_v59 = vpop.f32.mrb[29].mxu0 }
 0x404   : > { %v1639_v12 = vmul.f32 %v1623_v42, %v1576_v59 }
 0x406   : > { %2387 = vmatprep.mubr.f32.mxu1 %v1639_v12 }
 0x407   : > { %2388 = vmatmul.mubr.f32.gmra.mrb[28].mxu1 %v1640_v40 }
 0x40a   : > { %v2336_v13 = vpop.f32.mrb[30].mxu0 }
 0x40b   : > { %v1642_v43 = vmul.f32 %v2336_v13, %v1626_v41  ;;  %v1586_v32 = vpop.f32.mrb[31].mxu0  ;;  %v3867_v13 = vld [vmem:[#allocation21_spill] sm:$0xff] }
 0x40c   : > { %v1641_v60 = vmul.f32 %v1625_v11, %v1586_v32  ;;  %v3868_v11 = vld [vmem:[#allocation26_spill] sm:$0xff] }
 0x40e   : > { %2390 = vmatprep.mubr.f32.mxu1 %v1641_v60 }
 0x40f   : > { %2391 = vmatmul.mubr.f32.gmra.mrb[30].mxu1 %v1642_v43  ;;  %v3869_v43 = vld [vmem:[#allocation23_spill] sm:$0xff] }
 0x4a4   : > { %v2371_v20 = vpop.f32.mrb[16].mxu1 }
 0x4a5   : > { %v1805_v25 = vmul.f32 %v2371_v20, %v3332_v54  ;;  %v1725_v9 = vpop.f32.mrb[17].mxu1  ;;  %v3870_v20 = vld [vmem:[#allocation25_spill] sm:$0xff] }
 0x4a6   : > { %v1804_v53 = vmul.f32 %v1725_v9, %v3330_v49 }
 0x4a7   : > { %v1821_v16 = vadd.f32 %v1805_v25, %v3393_v46  ;;  %v3871_v25 = vld [vmem:[#allocation22_spill] sm:$0xff] }
 0x4a8   : > { %v1820_v14 = vadd.f32 %v1804_v53, %v3376_v34  ;;  %v2374_v63 = vpop.f32.mrb[18].mxu1  ;;  %v3872_v53 = vld [vmem:[#allocation27_spill] sm:$0xff] }
 0x4a9   : > { %v1837_v27 = vsub.f32 0.0, %v1821_v16  ;;  %v1807_v2 = vmul.f32 %v2374_v63, %v3361_v15  ;;  %v1735_v28 = vpop.f32.mrb[19].mxu1 }
 0x4aa   : > { %v1836_v8 = vsub.f32 0.0, %v1820_v14  ;;  %v1806_v52 = vmul.f32 %v1735_v28, %v3334_v57  ;;  %v3873_v14 = vld [vmem:[#allocation24_spill] sm:$0xff]  ;;  %v3875_v28 = vld [vmem:[#allocation29_spill] sm:$0xff] }
 0x4ab   : > { %v1853_v38 = vmul.f32 %v1837_v27, %v3385_v39  ;;  %v1823_v54 = vadd.f32 %v1807_v2, %v3403_v1  ;;  %v3874_v27 = vld [vmem:[#allocation32_spill] sm:$0xff] }
 0x4ac   : > { %v1852_v49 = vmul.f32 %v1836_v8, %v3367_v23  ;;  %v1822_v44 = vadd.f32 %v1806_v52, %v3396_v47 }
 0x4ad   : > { %1869 = vst [vmem:[%s3684_s24 + $0x8] sm:$0xff] %v1853_v38  ;;  %v1839_v15 = vsub.f32 0.0, %v1823_v54  ;;  %v3876_v54 = vld [vmem:[#allocation31_spill] sm:$0xff] }
 0x4ae   : > { %1868 = vst [vmem:[%s3684_s24] sm:$0xff] %v1852_v49  ;;  %v1838_v34 = vsub.f32 0.0, %v1822_v44  ;;  %v3877_v44 = vld [vmem:[#allocation28_spill] sm:$0xff] }
 0x4af   : > { %v1855_v57 = vmul.f32 %v1839_v15, %v3390_v29 }
 0x4b0   : > { %v1854_v39 = vmul.f32 %v1838_v34, %v3379_v37 }
 0x4b1   : > { %1871 = vst [vmem:[%s3684_s24 + $0x18] sm:$0xff] %v1855_v57  ;;  %v3878_v57 = vld [vmem:[#allocation33_spill] sm:$0xff] }
 0x4b2   : > { %1870 = vst [vmem:[%s3684_s24 + $0x10] sm:$0xff] %v1854_v39  ;;  %v2377_v23 = vpop.f32.mrb[20].mxu1 }
 0x4b3   : > { %v1809_v46 = vmul.f32 %v2377_v23, %v3400_v51  ;;  %v1745_v47 = vpop.f32.mrb[21].mxu1 }
 0x4b4   : > { %v1808_v1 = vmul.f32 %v1745_v47, %v3388_v45 }
 0x4b5   : > { %v1825_v50 = vadd.f32 %v1809_v46, %v3425_v62  ;;  %v3879_v46 = vld [vmem:[#allocation30_spill] sm:$0xff] }
 0x4b6   : > { %v1824_v7 = vadd.f32 %v1808_v1, %v3417_v35  ;;  %v3880_v1 = vld [vmem:[#allocation37_spill] sm:$0xff] }
 0x4b7   : > { %v1841_v58 = vsub.f32 0.0, %v1825_v50 }
 0x4b8   : > { %v1840_v48 = vsub.f32 0.0, %v1824_v7  ;;  %v3881_v7 = vld [vmem:[#allocation35_spill] sm:$0xff] }
 0x4b9   : > { %v1857_v29 = vmul.f32 %v1841_v58, %v3421_v61 }
 0x4ba   : > { %v1856_v37 = vmul.f32 %v1840_v48, %v3412_v31 }
 0x4bb   : > { %1873 = vst [vmem:[%s3684_s24 + $0x28] sm:$0xff] %v1857_v29 }
 0x4bc   : > { %1872 = vst [vmem:[%s3684_s24 + $0x20] sm:$0xff] %v1856_v37  ;;  %v3882_v37 = vld [vmem:[#allocation36_spill] sm:$0xff] }
 0x4be   : > { %v2380_v5 = vpop.f32.mrb[22].mxu1 }
 0x4bf   : > { %v1811_v51 = vmul.f32 %v2380_v5, %v3427_v4  ;;  %v1755_v18 = vpop.f32.mrb[23].mxu1 }
 0x4c0   : > { %v1810_v45 = vmul.f32 %v1755_v18, %v3419_v56 }
 0x4c1   : > { %v1827_v62 = vadd.f32 %v1811_v51, %v3452_v36  ;;  %v3884_v51 = vld [vmem:[#allocation34_spill] sm:$0xff] }
 0x4c2   : > { %v1826_v35 = vadd.f32 %v1810_v45, %v3443_v24 }
 0x4c3   : > { %v1843_v22 = vsub.f32 0.0, %v1827_v62 }
 0x4c4   : > { %v1842_v42 = vsub.f32 0.0, %v1826_v35 }
 0x4c5   : > { %v1859_v40 = vmul.f32 %v1843_v22, %v3447_v33 }
 0x4c6   : > { %v1858_v61 = vmul.f32 %v1842_v42, %v3437_v21 }
 0x4c7   : > { %1875 = vst [vmem:[%s3684_s24 + $0x38] sm:$0xff] %v1859_v40 }
 0x4c8   : > { %1874 = vst [vmem:[%s3684_s24 + $0x30] sm:$0xff] %v1858_v61 }
 0x4ca   : > { %v2383_v31 = vpop.f32.mrb[24].mxu1 }
 0x4cb   : > { %v1813_v4 = vmul.f32 %v2383_v31, %v3454_v55  ;;  %v1765_v59 = vpop.f32.mrb[25].mxu1 }
 0x4cc   : > { %v1812_v56 = vmul.f32 %v1765_v59, %v3445_v30 }
 0x4cd   : > { %v1829_v36 = vadd.f32 %v1813_v4, %v3480_v0 }
 0x4ce   : > { %v1828_v24 = vadd.f32 %v1812_v56, %v3468_v19 }
 0x4cf   : > { %v1845_v12 = vsub.f32 0.0, %v1829_v36 }
 0x4d0   : > { %v1844_v17 = vsub.f32 0.0, %v1828_v24 }
 0x4d1   : > { %v1861_v33 = vmul.f32 %v1845_v12, %v3472_v26 }
 0x4d2   : > { %v1860_v21 = vmul.f32 %v1844_v17, %v3463_v3  ;;  %v2386_v10 = vpop.f32.mrb[26].mxu1 }
 0x4d3   : > { %1877 = vst [vmem:[%s3684_s24 + $0x48] sm:$0xff] %v1861_v33  ;;  %v1815_v41 = vmul.f32 %v2386_v10, %v3482_v6  ;;  %v1775_v55 = vpop.f32.mrb[27].mxu1 }
 0x4d4   : > { %1876 = vst [vmem:[%s3684_s24 + $0x40] sm:$0xff] %v1860_v21  ;;  %v1814_v30 = vmul.f32 %v1775_v55, %v3867_v13 }
 0x4d5   : > { %v1831_v0 = vadd.f32 %v1815_v41, %v3868_v11 }
 0x4d6   : > { %v1830_v19 = vadd.f32 %v1814_v30, %v3869_v43 }
 0x4d7   : > { %v1847_v32 = vsub.f32 0.0, %v1831_v0 }
 0x4d8   : > { %v1846_v60 = vsub.f32 0.0, %v1830_v19 }
 0x4d9   : > { %v1863_v26 = vmul.f32 %v1847_v32, %v3870_v20 }
 0x4da   : > { %v1862_v3 = vmul.f32 %v1846_v60, %v3871_v25  ;;  %v2389_v9 = vpop.f32.mrb[28].mxu1 }
 0x4db   : > { %1879 = vst [vmem:[%s3684_s24 + $0x58] sm:$0xff] %v1863_v26  ;;  %v1817_v6 = vmul.f32 %v2389_v9, %v3872_v53  ;;  %v1785_v16 = vpop.f32.mrb[29].mxu1 }
 0x4dc   : > { %1878 = vst [vmem:[%s3684_s24 + $0x50] sm:$0xff] %v1862_v3  ;;  %v1816_v63 = vmul.f32 %v1785_v16, %v3873_v14 }
 0x4dd   : > { %v1833_v2 = vadd.f32 %v1817_v6, %v3874_v27 }
 0x4de   : > { %v1832_v8 = vadd.f32 %v1816_v63, %v3875_v28 }
 0x4df   : > { %v1849_v52 = vsub.f32 0.0, %v1833_v2 }
 0x4e0   : > { %v1848_v38 = vsub.f32 0.0, %v1832_v8 }
 0x4e1   : > { %v1865_v49 = vmul.f32 %v1849_v52, %v3876_v54 }
 0x4e2   : > { %v1864_v15 = vmul.f32 %v1848_v38, %v3877_v44  ;;  %v2392_v34 = vpop.f32.mrb[30].mxu1 }
 0x4e3   : > { %1881 = vst [vmem:[%s3684_s24 + $0x68] sm:$0xff] %v1865_v49  ;;  %v1819_v39 = vmul.f32 %v2392_v34, %v3878_v57  ;;  %v1795_v23 = vpop.f32.mrb[31].mxu1 }
 0x4e4   : > { %1880 = vst [vmem:[%s3684_s24 + $0x60] sm:$0xff] %v1864_v15  ;;  %v1818_v47 = vmul.f32 %v1795_v23, %v3879_v46 }
 0x4e5   : > { %v1835_v50 = vadd.f32 %v1819_v39, %v3880_v1 }
 0x4e6   : > { %v1834_v58 = vadd.f32 %v1818_v47, %v3881_v7 }
 0x4e7   : > { %v1851_v48 = vsub.f32 0.0, %v1835_v50 }
 0x4e8   : > { %v1850_v29 = vsub.f32 0.0, %v1834_v58 }
 0x4e9   : > { %v1867_v5 = vmul.f32 %v1851_v48, %v3882_v37 }
 0x4ea   : > { %v1866_v18 = vmul.f32 %v1850_v29, %v3884_v51 }
 0x4eb   : > { %1883 = vst [vmem:[%s3684_s24 + $0x78] sm:$0xff] %v1867_v5 }
 0x4ec   : > { %1882 = vst [vmem:[%s3684_s24 + $0x70] sm:$0xff] %v1866_v18 }
 0x4ed   : > { %2861 = shalt.err (!%p2858_p0)
}
 0x4ee   : > { %s2862_s22 = scalar_lea.hbm %s3742_s30, 2048  ;;  %s2866_s23 = scalar_lea.hbm %s3883_s25, 4096 }
 0x4ef   : > { %p2863_p10 = scmp.ne.s32.totalorder %s3742_s30, %s2862_s22  ;;  %p2867_p4 = scmp.lt.u32.totalorder %s3742_s30, %s3883_s25 }
 0x4f0   : > { %p2868_p12 = scmp.lt.u32.totalorder %s2866_s23, %s2862_s22  ;;  %p2870_p8 = scmp.lt.u32.totalorder %s2862_s22, %s3742_s30 }
 0x4f1   : > { %p2864_p2 = pnand %p2863_p10, %p3885_p11 }
 0x4f2   : > { %p2869_p7 = por %p2868_p12, %p2867_p4 }
 0x4f3   : > { %p2865_p3 = pneg %p2864_p2 }
 0x4f4   : > { %p2871_p13 = por %p2870_p8, %p2869_p7 }
 0x4f6   : > { %p2872_p1 = pnand %p2871_p13, %p2865_p3 }
 0x4f8   : > { %2875 = shalt.err (!%p2872_p1)
}
 0x4f9   : > { %s2932_s24 = smov 128   ;;  %s2933_s26 = smov 8  }
 0x4fa   : > { %2537 = dma.vmem_to_hbm [thread:$0]  (%p3885_p11), %s3744_s17, 2048, %s3742_s30, %s3751_s21, %s2932_s24, %s2932_s24, %s2933_s26  }
 0x4fb PF: > { %s3886_s20 = sld [smem:[#allocation17_spill]]  ;;  %s3887_s28 = sld [smem:[#allocation15_spill]] }
 0x4fc   : > { %s3888_s14 = sld [smem:[#allocation20_spill]] }
 0x501   : > { %p2564_p6 = scmp.ge.s32.totalorder %s3886_s20, 2  ;;  %s1913_s16 = sand.u32 1, %s3887_s28  }
 0x502   : > { %p3889_p9 = scmp.ne.s32.totalorder %s3888_s14, 0  ;;  %s1914_s19 = scalar_lea.sflag [#allocation4], %s1913_s16 }
 0x504   : > { %p2553_p5 = pnand %p2564_p6, %p3889_p9 }
 0x506   : > { %2905 = dma.done.wait (!%p2553_p5), %s1914_s19, 2048  }
 0x507   : > { %2907 = vsyncadd (!%p2553_p5), %s1914_s19, 4294965248  ;;  %s3890_s20 = sld [smem:[#allocation18_spill]]  ;;  %s3891_s12 = sld [smem:[#allocation16_spill]] }
 0x508   : > { %s3892_s19 = sld [smem:[#allocation19_spill]]  ;;  %s3893_s17 = smov %s2914_s18 }
 0x50d   : > { %p24_p0 = scmp.ge.s32.totalorder %s3890_s20, 4   ;;  %s3894_s18 = smov %s3891_s12 }
 0x50f   :  { %26 = sbr.rel (!%p24_p0) target bundleno = 8 (0x8), region = 119 }
 0x516   :  { %1919 = vsyncpa [#allocation3], 1 }
 0x517   :  { %1921 = vsyncpa [#allocation3 + $0x1], 1 }
 0x518   :  { %1922 = vsyncpa [#allocation6], 1 }
 0x519   :  { %1923 = vsyncpa [#allocation9], 1 }
 0x51a   :  { %1924 = vsyncpa [#allocation4], 1 }
 0x51b   :  { %1926 = vsyncpa [#allocation4 + $0x1], 1 }

</bundles_post_ra>
